<compile_context>
chip_gen: v6e
topology: v6e:2x2x1
jax: 0.10.0
libtpu: 0.0.40
codegen_flags: <defaults>
</compile_context>

<pallas_src>
import jax
import jax.numpy as jnp
from jax.experimental import pallas as pl
from jax.experimental.pallas import tpu as pltpu


def _round_up(v, m):
    return ((v + m - 1) // m) * m


def _attn_net_kernel(x_ref, w1_ref, b1_ref, w2_ref, b2_ref, a_ref):
    # x_ref : (TN, L)      bf16   -- one row tile of the bag
    # w1_ref: (L, D)       bf16   -- resident
    # b1_ref: (1, D)       f32    -- resident
    # w2_ref: (D, NC_PAD)  f32    -- resident (zero-padded columns)
    # b2_ref: (1, NC_PAD)  f32    -- resident (zero-padded columns)
    # a_ref : (TN, NC_PAD) f32
    h = jnp.dot(x_ref[...], w1_ref[...],
                preferred_element_type=jnp.float32)            # (TN, D) MXU, f32 acc
    h = jnp.tanh(h + b1_ref[...])                              # VPU/EUP, f32
    a = jnp.dot(h, w2_ref[...],
                preferred_element_type=jnp.float32)            # (TN, NC_PAD)
    a_ref[...] = (a + b2_ref[...]).astype(a_ref.dtype)


def attn_net_forward(x, w1, b1, w2, b2, *, tn=512):
    """Pallas forward of CLAM Attn_Net.  x: (N, L).  Returns (A, x)."""
    N, L = x.shape
    D = w1.shape[1]
    n_classes = w2.shape[1]

    # ---- wrapper-side layout prep (cheap, once per call) -------------------
    # bf16 inputs for the dominant matmul (MXU-native on v5e/v6e/v7x, halves
    # HBM traffic for x); accumulation remains f32 inside the kernel.
    x_bf = x.astype(jnp.bfloat16)
    w1_bf = w1.astype(jnp.bfloat16)
    b1_f = b1.reshape(1, D).astype(jnp.float32)

    # Lane-dense output: pad class dim to a multiple of 128.
    nc_pad = _round_up(max(n_classes, 1), 128)
    w2_p = jnp.zeros((D, nc_pad), jnp.float32).at[:, :n_classes].set(
        w2.astype(jnp.float32))
    b2_p = jnp.zeros((1, nc_pad), jnp.float32).at[:, :n_classes].set(
        b2.reshape(1, n_classes).astype(jnp.float32))

    # Row tiling over the bag; clamp the tile for small bags, pad the tail.
    tn_eff = min(tn, _round_up(N, 8))
    n_pad = _round_up(N, tn_eff)
    if n_pad != N:
        x_bf = jnp.pad(x_bf, ((0, n_pad - N), (0, 0)))
    grid = (n_pad // tn_eff,)

    cost = pl.CostEstimate(
        flops=2 * n_pad * L * D + 2 * n_pad * D * nc_pad,
        transcendentals=n_pad * D,
        bytes_accessed=(n_pad * L * 2          # x (bf16)
                        + L * D * 2            # w1 (bf16)
                        + D * 4                # b1
                        + D * nc_pad * 4       # w2 (padded)
                        + nc_pad * 4           # b2 (padded)
                        + n_pad * nc_pad * 4), # output
    )

    a_pad = pl.pallas_call(
        _attn_net_kernel,
        out_shape=jax.ShapeDtypeStruct((n_pad, nc_pad), jnp.float32),
        grid=grid,
        in_specs=[
            pl.BlockSpec((tn_eff, L), lambda i: (i, 0)),    # x: pipelined tiles
            pl.BlockSpec((L, D), lambda i: (0, 0)),         # w1: VMEM-resident
            pl.BlockSpec((1, D), lambda i: (0, 0)),         # b1: VMEM-resident
            pl.BlockSpec((D, nc_pad), lambda i: (0, 0)),    # w2: VMEM-resident
            pl.BlockSpec((1, nc_pad), lambda i: (0, 0)),    # b2: VMEM-resident
        ],
        out_specs=pl.BlockSpec((tn_eff, nc_pad), lambda i: (i, 0)),
        compiler_params=pltpu.CompilerParams(
            dimension_semantics=("parallel",),   # v7x: shard row tiles over 2 TCs
            vmem_limit_bytes=32 << 20,           # safe on v7x's 64 MiB physical VMEM
        ),
        cost_estimate=cost,
    )(x_bf, w1_bf, b1_f, w2_p, b2_p)

    a = a_pad[:N, :n_classes].astype(x.dtype)
    return a, x


def init_params(key, L, D, n_classes, dtype=jnp.float32):
    """Deterministic init mimicking PyTorch Linear default (U[-1/sqrt(fan_in), +])."""
    k1, k2, k3, k4 = jax.random.split(key, 4)
    lim1 = 1.0 / (L ** 0.5)
    lim2 = 1.0 / (D ** 0.5)
    w1 = jax.random.uniform(k1, (L, D), dtype, -lim1, lim1)
    b1 = jax.random.uniform(k2, (1, D), dtype, -lim1, lim1)
    w2 = jax.random.uniform(k3, (D, n_classes), dtype, -lim2, lim2)
    b2 = jax.random.uniform(k4, (1, n_classes), dtype, -lim2, lim2)
    return w1, b1, w2, b2


if __name__ == "__main__":
    # Module defaults: L=1024, D=256, n_classes=1.  Use a modest bag of N=300
    # instances (deliberately not a multiple of the tile) so the demo exercises
    # the multi-step grid, resident weights, and tail padding while staying small.
    N, L, D, n_classes = 300, 1024, 256, 1

    key = jax.random.PRNGKey(0)
    kx, kp = jax.random.split(key)
    x = jax.random.normal(kx, (N, L), jnp.float32)
    w1, b1, w2, b2 = init_params(kp, L, D, n_classes)

    # Smaller tile here (still >=256) just so the tiny demo runs >1 grid step;
    # production default tn=512 amortizes per-step overhead on real bags.
    a, x_out = attn_net_forward(x, w1, b1, w2, b2, tn=256)
    a = jax.block_until_ready(a)
    x_out = jax.block_until_ready(x_out)

    # Reference in plain JAX (full f32).  bf16 MXU inputs (f32 accumulate)
    # => loosened tolerance vs the pure-f32 reference.
    ref = jnp.tanh(x @ w1 + b1) @ w2 + b2
    assert a.shape == (N, n_classes)
    assert x_out.shape == (N, L)
    assert jnp.allclose(a, ref, atol=2e-2, rtol=2e-2), float(jnp.max(jnp.abs(a - ref)))
    assert jnp.array_equal(x_out, x)

    print("KERNEL_OK")
</pallas_src>

<mosaic_0001>
module attributes {stable_mosaic.version = 11 : i64} {
  func.func @_attn_net_kernel(%arg0: i32, %arg1: memref<256x1024xbf16, #tpu.memory_space<vmem>>, %arg2: memref<1024x256xbf16, #tpu.memory_space<vmem>>, %arg3: memref<1x256xf32, #tpu.memory_space<vmem>>, %arg4: memref<256x128xf32, #tpu.memory_space<vmem>>, %arg5: memref<1x128xf32, #tpu.memory_space<vmem>>, %arg6: memref<256x128xf32, #tpu.memory_space<vmem>>) attributes {dimension_semantics = [#tpu.dimension_semantics<parallel>], iteration_bounds = array<i64: 2>, scalar_prefetch = 0 : i64, scratch_operands = 0 : i64, tpu.core_type = #tpu.core_type<tc>, window_params = [{transform_indices = @transform_0, window_bounds = array<i64: 256, 1024>}, {pipeline_mode = #tpu.pipeline_mode<synchronous>, transform_indices = @transform_1, window_bounds = array<i64: 1024, 256>}, {pipeline_mode = #tpu.pipeline_mode<synchronous>, transform_indices = @transform_2, window_bounds = array<i64: 1, 256>}, {pipeline_mode = #tpu.pipeline_mode<synchronous>, transform_indices = @transform_3, window_bounds = array<i64: 256, 128>}, {pipeline_mode = #tpu.pipeline_mode<synchronous>, transform_indices = @transform_4, window_bounds = array<i64: 1, 128>}, {transform_indices = @transform_5, window_bounds = array<i64: 256, 128>}]} {
    %c0 = arith.constant 0 : index
    %c0_0 = arith.constant 0 : index
    %0 = vector.load %arg1[%c0, %c0_0] : memref<256x1024xbf16, #tpu.memory_space<vmem>>, vector<256x1024xbf16>
    %c0_1 = arith.constant 0 : index
    %c0_2 = arith.constant 0 : index
    %1 = vector.load %arg2[%c0_1, %c0_2] : memref<1024x256xbf16, #tpu.memory_space<vmem>>, vector<1024x256xbf16>
    %cst = arith.constant dense<0.000000e+00> : vector<256x256xf32>
    %2 = tpu.matmul %0, %1, %cst {dimension_numbers = #tpu.dot_dimension_numbers<[1], [0], [0], [1], [0, 0, 1, 1], [], []>} : vector<256x1024xbf16>, vector<1024x256xbf16>, vector<256x256xf32> -> vector<256x256xf32>
    %c0_3 = arith.constant 0 : index
    %c0_4 = arith.constant 0 : index
    %3 = vector.load %arg3[%c0_3, %c0_4] : memref<1x256xf32, #tpu.memory_space<vmem>>, vector<1x256xf32>
    %4 = vector.broadcast %3 : vector<1x256xf32> to vector<256x256xf32>
    %5 = arith.addf %2, %4 : vector<256x256xf32>
    %6 = math.tanh %5 : vector<256x256xf32>
    %c0_5 = arith.constant 0 : index
    %c0_6 = arith.constant 0 : index
    %7 = vector.load %arg4[%c0_5, %c0_6] : memref<256x128xf32, #tpu.memory_space<vmem>>, vector<256x128xf32>
    %cst_7 = arith.constant dense<0.000000e+00> : vector<256x128xf32>
    %8 = tpu.matmul %6, %7, %cst_7 {dimension_numbers = #tpu.dot_dimension_numbers<[1], [0], [0], [1], [0, 0, 1, 1], [], []>} : vector<256x256xf32>, vector<256x128xf32>, vector<256x128xf32> -> vector<256x128xf32>
    %c0_8 = arith.constant 0 : index
    %c0_9 = arith.constant 0 : index
    %9 = vector.load %arg5[%c0_8, %c0_9] : memref<1x128xf32, #tpu.memory_space<vmem>>, vector<1x128xf32>
    %10 = vector.broadcast %9 : vector<1x128xf32> to vector<256x128xf32>
    %11 = arith.addf %8, %10 : vector<256x128xf32>
    %c0_10 = arith.constant 0 : index
    %c0_11 = arith.constant 0 : index
    %12 = vector.load %arg6[%c0_10, %c0_11] : memref<256x128xf32, #tpu.memory_space<vmem>>, vector<256x128xf32>
    tpu.vector_store %arg6[%c0_10, %c0_11], %11 {strides = array<i32>} : memref<256x128xf32, #tpu.memory_space<vmem>>, vector<256x128xf32>,
    return
  }
  func.func @transform_0(%arg0: i32) -> (i32, i32) {
    %c0_i32 = arith.constant 0 : i32
    %c0_i32_0 = arith.constant 0 : i32
    return %arg0, %c0_i32 : i32, i32
  }
  func.func @transform_1(%arg0: i32) -> (i32, i32) {
    %c0_i32 = arith.constant 0 : i32
    %c0_i32_0 = arith.constant 0 : i32
    %c0_i32_1 = arith.constant 0 : i32
    return %c0_i32, %c0_i32_0 : i32, i32
  }
  func.func @transform_2(%arg0: i32) -> (i32, i32) {
    %c0_i32 = arith.constant 0 : i32
    %c0_i32_0 = arith.constant 0 : i32
    %c0_i32_1 = arith.constant 0 : i32
    return %c0_i32, %c0_i32_0 : i32, i32
  }
  func.func @transform_3(%arg0: i32) -> (i32, i32) {
    %c0_i32 = arith.constant 0 : i32
    %c0_i32_0 = arith.constant 0 : i32
    %c0_i32_1 = arith.constant 0 : i32
    return %c0_i32, %c0_i32_0 : i32, i32
  }
  func.func @transform_4(%arg0: i32) -> (i32, i32) {
    %c0_i32 = arith.constant 0 : i32
    %c0_i32_0 = arith.constant 0 : i32
    %c0_i32_1 = arith.constant 0 : i32
    return %c0_i32, %c0_i32_0 : i32, i32
  }
  func.func @transform_5(%arg0: i32) -> (i32, i32) {
    %c0_i32 = arith.constant 0 : i32
    %c0_i32_0 = arith.constant 0 : i32
    return %arg0, %c0_i32 : i32, i32
  }
}

</mosaic_0001>

<bundles_post_ra>
// kernel: tpu_custom_call.1
= control target key start
LH: loop header
LB: loop body
LE: loop exit
PB: predicated region body
PF: predicated region fallthrough
CT: control target
= control target key end

     0   :  { %10 = vsyncpa [#allocation3], 0  ;;  %s5016_s0 = inlined_call_operand.hbm [shape: bf16[512,1024], index: 0, kind: input, shape index: {}]   ;;  %s5017_s1 = inlined_call_operand.hbm [shape: bf16[1024,256], index: 1, kind: input, shape index: {}]   ;;  %s5018_s2 = inlined_call_operand.vmem [shape: f32[1,256], index: 2, kind: input, shape index: {}]   ;;  %s5019_s3 = inlined_call_operand.hbm [shape: f32[256,128], index: 3, kind: input, shape index: {}]   ;;  %s5020_s4 = inlined_call_operand.vmem [shape: f32[1,128], index: 4, kind: input, shape index: {}]   ;;  %s5021_s5 = inlined_call_operand.hbm [shape: f32[512,128], index: 5, kind: output, shape index: {}]  }
   0x1   :  { %12 = vsyncpa [#allocation3 + $0x1], 0 }
   0x2   :  { %13 = vsyncpa [#allocation6], 0 }
   0x3   :  { %14 = vsyncpa [#allocation4], 0 }
   0x4   :  { %16 = vsyncpa [#allocation4 + $0x1], 0  ;;  %s3957_s18 = smov 0   ;;  %s3959_s19 = smov 0  }
   0x5   :  { %s3961_s20 = smov 0   ;;  %s3963_s21 = smov 0  }
   0x6 LB: > { %s3978_s22 = sadd.s32 4294967295, %s3914_s21   ;;  %s3061_s23 = sadd.s32 4294967294, %s3914_s21   ;;  %s3914_s21 = sphi %s3963_s21, %s5210_s21   ;;  %s3910_s20 = sphi %s3961_s20, %s5209_s20   ;;  %s3906_s19 = sphi %s3959_s19, %s5208_s19   ;;  %s3902_s18 = sphi %s3957_s18, %s5207_s18  }
   0x7   : > { %p42_p0 = scmp.ne.s32.totalorder %s3906_s19, %s3902_s18  ;;  %p5022_p1 = scmp.eq.s32.totalorder %s3978_s22, 0 }
   0x8   : > { %p156_p3 = scmp.eq.s32.totalorder %s3061_s23, 1  ;;  %p3062_p5 = scmp.ge.s32.totalorder %s3914_s21, 1 }
   0x9   : > { %p3987_p4 = por %p5022_p1, %p42_p0  ;;  %p163_p7 = scmp.lt.s32.totalorder %s3914_s21, 3 }
   0xa   : > { %p3992_p6 = por %p156_p3, %p42_p0  ;;  %s3916_s27 = smov [#allocation5]  }
   0xb   : > { %s5028_s24 = scalar_select %p3987_p4, 1, 0 }
   0xc   : > { %s5029_s25 = scalar_select %p3992_p6, 1, 0 }
   0xd   : > { %p3997_p8 = pnand %p3062_p5, %p163_p7  ;;  %s175_s28 = sshll.u32 %s3916_s27, 4  ;;  %s176_s28 = int_to_ptr.vmem [resolvable:$true] %s175_s28 }
   0xe   : > { %s3917_s30 = smov [#allocation7]   ;;  %s3777_s7 = scalar_lea.vmem %s176_s28, 16384 }
   0xf   : > { %s5030_s26 = scalar_select %p3997_p8, 1, 0 }
  0x10   : > { %p3384_p9 = pneg %p3997_p8  ;;  %s191_s6 = sshll.u32 %s3917_s30, 4  ;;  %s192_s6 = int_to_ptr.vmem [resolvable:$true] %s191_s6 }
  0x11   : > { %p3778_p13 = scmp.ne.s32.totalorder %s176_s28, %s3777_s7  ;;  %p3785_p5 = scmp.lt.s32.totalorder %s176_s28, %s176_s28 }
  0x12   : > { %p4006_p11 = pnand %p3384_p9, %p5022_p1  ;;  %p3786_p7 = scmp.lt.s32.totalorder %s3777_s7, %s3777_s7 }
  0x14   : > { %p3768_p12 = pneg %p4006_p11  ;;  %p3787_p10 = por %p3786_p7, %p3785_p5 }
  0x16   : > { %p3780_p0 = pnand %p3778_p13, %p3768_p12 }
  0x18   : > { %p3781_p3 = pneg %p3780_p0 }
  0x1a   : > { %p3788_p9 = pnand %p3787_p10, %p3781_p3 }
  0x1c   : > { %3791 = shalt.err (!%p3788_p9)
}
  0x1d   : > { %s3918_s8 = smov 128   ;;  %s3919_s9 = smov 8  }
  0x1e   : > { %3387 = dma.hbm_to_vmem [thread:$0]  (!%p4006_p11), %s5017_s1, 16384, %s176_s28, [#allocation6], %s3918_s8, %s3918_s8, %s3919_s9  }
  0x1f   : > { %s3803_s12 = scalar_lea.vmem %s192_s6, 4096  ;;  %p3811_p2 = scmp.lt.s32.totalorder %s192_s6, %s192_s6 }
  0x20   : > { %p3804_p1 = scmp.ne.s32.totalorder %s192_s6, %s3803_s12  ;;  %p3812_p6 = scmp.lt.s32.totalorder %s3803_s12, %s3803_s12 }
  0x22   : > { %p3806_p13 = pnand %p3804_p1, %p3768_p12  ;;  %p3813_p5 = por %p3812_p6, %p3811_p2 }
  0x24   : > { %p3807_p0 = pneg %p3806_p13 }
  0x26   : > { %p3814_p10 = pnand %p3813_p5, %p3807_p0 }
  0x28   : > { %3817 = shalt.err (!%p3814_p10)
}
  0x29   : > { %3390 = dma.hbm_to_vmem [thread:$0]  (!%p4006_p11), %s5019_s3, 4096, %s192_s6, [#allocation6], %s3918_s8, %s3918_s8, %s3919_s9  }
  0x2a   : > { %s4029_s15 = sadd.s32 1, %s3914_s21   ;;  %s29_s16 = sadd.s32 1, %s3910_s20 }
  0x2b   : > { %s26_s17 = ssub.s32 %s3914_s21, %s4029_s15  ;;  %p36_p1 = scmp.ne.s32.totalorder %s3910_s20, %s3906_s19 }
  0x2c   : > { %p27_p2 = scmp.eq.s32.totalorder %s26_s17, 0  ;;  %p37_p6 = scmp.eq.s32.totalorder %s3914_s21, 0 }
  0x2d   : > { %p5032_p12 = scmp.eq.s32.totalorder %s3978_s22, 1  ;;  %p3401_p7 = scmp.lt.s32.totalorder %s3914_s21, 2 }
  0x2e   : > { %s4045_s27 = scalar_select %p27_p2, %s3910_s20, %s29_s16  }
  0x2f   : > { %p4039_p3 = por %p5032_p12, %p36_p1  ;;  %p38_p9 = por %p37_p6, %p36_p1 }
  0x30   : > { %s208_s28 = sand.u32 1, %s3910_s20   ;;  %s3338_s30 = sshll.u32 %s3914_s21, 14 }
  0x31   : > { %s5033_s23 = scalar_select %p4039_p3, 1, 0 }
  0x32   : > { %s3066_s29 = sshll.u32 %s208_s28, 10  ;;  %s4052_s8 = scalar_lea.hbm %s5016_s0, %s3338_s30 }
  0x33   : > { %s212_s9 = scalar_lea.vmem [#allocation2], %s3066_s29  ;;  %p4056_p11 = pnand %p3401_p7, %p38_p9 }
  0x34   : > { %s220_s10 = sshll.u32 %s212_s9, 4  ;;  %s4060_s12 = scalar_lea.sflag [#allocation3], %s208_s28  ;;  %s4054_s10 = int_to_ptr.vmem [resolvable:$true] %s220_s10 }
  0x35   : > { %s3818_s13 = scalar_lea.hbm %s4052_s8, 16384  ;;  %p3820_p0 = pneg %p4056_p11 }
  0x36   : > { %p3819_p13 = scmp.ne.s32.totalorder %s4052_s8, %s3818_s13  ;;  %s3823_s17 = scalar_lea.hbm %s5016_s0, 32768 }
  0x37   : > { %p3824_p1 = scmp.lt.s32.totalorder %s4052_s8, %s5016_s0  ;;  %p3825_p2 = scmp.lt.s32.totalorder %s3823_s17, %s3818_s13 }
  0x38   : > { %p3821_p5 = pnand %p3820_p0, %p3819_p13 }
  0x39   : > { %p3826_p6 = por %p3825_p2, %p3824_p1 }
  0x3a   : > { %p3822_p10 = pneg %p3821_p5 }
  0x3c   : > { %p3827_p12 = pnand %p3826_p6, %p3822_p10 }
  0x3e   : > { %3830 = shalt.err (!%p3827_p12)
}
  0x3f   : > { %s3831_s28 = scalar_lea.vmem %s4054_s10, 16384  ;;  %s3920_s6 = smov [#allocation2]  }
  0x40   : > { %p3832_p7 = scmp.ne.s32.totalorder %s4054_s10, %s3831_s28  ;;  %s3836_s7 = sshll.u32 %s3920_s6, 4  ;;  %s3837_s7 = int_to_ptr.vmem [resolvable:$false] %s3836_s7 }
  0x41   : > { %s3838_s9 = scalar_lea.vmem %s3837_s7, 32768  ;;  %p3839_p5 = scmp.lt.s32.totalorder %s4054_s10, %s3837_s7 }
  0x42   : > { %p3834_p9 = pnand %p3832_p7, %p3820_p0  ;;  %p3840_p3 = scmp.lt.s32.totalorder %s3838_s9, %s3831_s28 }
  0x44   : > { %p3835_p13 = pneg %p3834_p9  ;;  %p3841_p4 = por %p3840_p3, %p3839_p5 }
  0x46   : > { %p3842_p8 = pnand %p3841_p4, %p3835_p13 }
  0x48   : > { %3845 = shalt.err (!%p3842_p8)
}
  0x49   : > { %s3921_s13 = smov 512   ;;  %s3922_s14 = smov 32  }
  0x4a   : > { %3394 = dma.hbm_to_vmem [thread:$0]  (!%p4056_p11), %s4052_s8, 16384, %s4054_s10, %s4060_s12, %s3921_s13, %s3921_s13, %s3922_s14  }
  0x4b   : > { %p5035_p0 = scmp.ne.s32.totalorder %s5030_s26, 0 }
  0x4d   : > { %232 = sbr.rel (%p5035_p0) target bundleno = 891 (0x37b), region = 40 }
  0x52   : > { %s4084_s16 = sand.u32 1, %s3906_s19   ;;  %p5036_p4 = scmp.ne.s32.totalorder %s5028_s24, 0 }
  0x53   : > { %s3071_s17 = sshll.u32 %s4084_s16, 10  ;;  %s235_s29 = scalar_lea.sflag [#allocation3], %s4084_s16 }
  0x54   : > { %s4088_s30 = scalar_lea.vmem [#allocation2], %s3071_s17 }
  0x55   : > { %3889 = dma.done.wait (%p5036_p4), %s235_s29, 16384  }
  0x56   : > { %3891 = vsyncadd (%p5036_p4), %s235_s29, 4294950912  ;;  %p5037_p8 = scmp.eq.s32.totalorder %s3978_s22, 0 }
  0x58   : > { %3893 = dma.done.wait (%p5037_p8), [#allocation6], 20480   ;;  %p5038_p3 = pmov %p5037_p8 }
  0x59   : > { %v3446_v0 = vld [vmem:[#allocation5 + $0x74] ss:$8 sps:$4 sm:$0xff]   ;;  %v3448_v1 = vld [vmem:[#allocation5 + $0x70] ss:$8 sps:$4 sm:$0xff]   ;;  %v3449_v2 = vld [vmem:[#allocation5 + $0x64] ss:$8 sps:$4 sm:$0xff]  }
  0x5a   : > { %3895 = vsyncadd (%p5038_p3), [#allocation6], 4294946816  ;;  %3340 = vmatprep.subr.bf16.mxu1 %v3446_v0  ;;  %1823 = vmatprep.subr.bf16.mxu0 %v3446_v0  ;;  %v3451_v3 = vld [vmem:[#allocation5 + $0x60] ss:$8 sps:$4 sm:$0xff]   ;;  %v3452_v4 = vld [vmem:[#allocation5 + $0x54] ss:$8 sps:$4 sm:$0xff]  }
  0x5b   : > { %3356 = vmatpush1.bf16.msra.mxu1 %v3448_v1  ;;  %1824 = vmatpush1.bf16.msra.mxu0 %v3448_v1  ;;  %v3454_v5 = vld [vmem:[#allocation5 + $0x50] ss:$8 sps:$4 sm:$0xff]   ;;  %v3455_v6 = vld [vmem:[#allocation5 + $0x44] ss:$8 sps:$4 sm:$0xff]   ;;  %v3457_v7 = vld [vmem:[#allocation5 + $0x40] ss:$8 sps:$4 sm:$0xff]  }
  0x5c   : > { %3341 = vmatprep.subr.bf16.mxu1 %v3449_v2  ;;  %1825 = vmatprep.subr.bf16.mxu0 %v3449_v2  ;;  %v3458_v8 = vld [vmem:[#allocation5 + $0x34] ss:$8 sps:$4 sm:$0xff]   ;;  %v3460_v9 = vld [vmem:[#allocation5 + $0x30] ss:$8 sps:$4 sm:$0xff]   ;;  %v3461_v10 = vld [vmem:[#allocation5 + $0x24] ss:$8 sps:$4 sm:$0xff]  }
  0x5d   : > { %v3463_v11 = vld [vmem:[#allocation5 + $0x20] ss:$8 sps:$4 sm:$0xff]   ;;  %v3464_v12 = vld [vmem:[#allocation5 + $0x14] ss:$8 sps:$4 sm:$0xff]   ;;  %v3466_v16 = vld [vmem:[#allocation5 + $0x10] ss:$8 sps:$4 sm:$0xff]  }
  0x5e   : > { %v4099_v13 = vld [vmem:[%s4088_s30 + $0x200] sm:$0xff]  ;;  %v3470_v22 = vld [vmem:[#allocation5 + $0xf4] ss:$8 sps:$4 sm:$0xff]   ;;  %v3472_v23 = vld [vmem:[#allocation5 + $0xf0] ss:$8 sps:$4 sm:$0xff]   ;;  %s3074_s8 = sshll.u32 %s4084_s16, 8 }
  0x5f   : > { %3357 = vmatpush1.bf16.msra.mxu1 %v3451_v3  ;;  %1826 = vmatpush1.bf16.msra.mxu0 %v3451_v3  ;;  %v4102_v14 = vld [vmem:[%s4088_s30 + $0x220] sm:$0xff]  ;;  %v3476_v26 = vld [vmem:[#allocation5 + $0xd4] ss:$8 sps:$4 sm:$0xff]   ;;  %v3478_v27 = vld [vmem:[#allocation5 + $0xd0] ss:$8 sps:$4 sm:$0xff]   ;;  %s4901_s12 = scalar_lea.vmem [#allocation8], %s3074_s8 }
  0x60   : > { %3342 = vmatprep.subr.bf16.mxu1 %v3452_v4  ;;  %1827 = vmatprep.subr.bf16.mxu0 %v3452_v4  ;;  %v3140_v15 = vcombine.high %v4099_v13, %v4102_v14  ;;  %v4107_v17 = vld [vmem:[%s4088_s30] sm:$0xff]  ;;  %v3482_v30 = vld [vmem:[#allocation5 + $0xb4] ss:$8 sps:$4 sm:$0xff]   ;;  %v3484_v31 = vld [vmem:[#allocation5 + $0xb0] ss:$8 sps:$4 sm:$0xff]   ;;  %v3139_v43 = vcombine.low %v4099_v13, %v4102_v14  ;;  %s3339_s28 = sshll.u32 %s3978_s22, 12 }
  0x61   : > { %v4110_v18 = vld [vmem:[%s4088_s30 + $0x20] sm:$0xff]  ;;  %v3488_v34 = vld [vmem:[#allocation5 + $0x94] ss:$8 sps:$4 sm:$0xff]   ;;  %v3490_v35 = vld [vmem:[#allocation5 + $0x90] ss:$8 sps:$4 sm:$0xff]   ;;  %s2969_s6 = sshll.u32 %s4901_s12, 4  ;;  %s4969_s13 = scalar_lea.hbm %s5021_s5, %s3339_s28  ;;  %s4971_s6 = int_to_ptr.vmem [resolvable:$true] %s2969_s6 }
  0x62   : > { %v3467_v19 = vld [vmem:[#allocation5 + $0x4] ss:$8 sps:$4 sm:$0xff]   ;;  %v3076_v20 = vcombine.high %v4107_v17, %v4110_v18  ;;  %1935 = vmatprep.mubr.bf16.mxu1 %v3140_v15  ;;  %v3469_v21 = vld [vmem:[#allocation5] ss:$8 sps:$4 sm:$0xff]   ;;  %v3496_v38 = vld [vmem:[#allocation5 + $0x174] ss:$8 sps:$4 sm:$0xff]   ;;  %v3075_v44 = vcombine.low %v4107_v17, %v4110_v18 }
  0x63   : > { %3358 = vmatpush1.bf16.msra.mxu1 %v3454_v5  ;;  %1828 = vmatpush1.bf16.msra.mxu0 %v3454_v5  ;;  %v3473_v24 = vld [vmem:[#allocation5 + $0xe4] ss:$8 sps:$4 sm:$0xff]   ;;  %v3475_v25 = vld [vmem:[#allocation5 + $0xe0] ss:$8 sps:$4 sm:$0xff]   ;;  %v3499_v39 = vld [vmem:[#allocation5 + $0x274] ss:$8 sps:$4 sm:$0xff]  }
  0x64   : > { %3343 = vmatprep.subr.bf16.mxu1 %v3455_v6  ;;  %1829 = vmatprep.subr.bf16.mxu0 %v3455_v6  ;;  %v3479_v28 = vld [vmem:[#allocation5 + $0xc4] ss:$8 sps:$4 sm:$0xff]   ;;  %v3481_v29 = vld [vmem:[#allocation5 + $0xc0] ss:$8 sps:$4 sm:$0xff]   ;;  %v3494_v46 = vld [vmem:[#allocation5 + $0x170] ss:$8 sps:$4 sm:$0xff]  }
  0x65   : > { %1855 = vmatprep.mubr.bf16.mxu0 %v3076_v20  ;;  %v3485_v32 = vld [vmem:[#allocation5 + $0xa4] ss:$8 sps:$4 sm:$0xff]   ;;  %v3487_v33 = vld [vmem:[#allocation5 + $0xa0] ss:$8 sps:$4 sm:$0xff]   ;;  %v3497_v47 = vld [vmem:[#allocation5 + $0x270] ss:$8 sps:$4 sm:$0xff]  }
  0x66   : > { %v3491_v36 = vld [vmem:[#allocation5 + $0x84] ss:$8 sps:$4 sm:$0xff]   ;;  %v3493_v37 = vld [vmem:[#allocation5 + $0x80] ss:$8 sps:$4 sm:$0xff]   ;;  %v3508_v54 = vld [vmem:[#allocation5 + $0x154] ss:$8 sps:$4 sm:$0xff]  }
  0x67   : > { %3359 = vmatpush1.bf16.msra.mxu1 %v3457_v7  ;;  %1830 = vmatpush1.bf16.msra.mxu0 %v3457_v7  ;;  %v347_v40 = vld [vmem:[%s4088_s30 + $0x240] sm:$0xff]  ;;  %v3511_v55 = vld [vmem:[#allocation5 + $0x254] ss:$8 sps:$4 sm:$0xff]   ;;  %v3506_v56 = vld [vmem:[#allocation5 + $0x150] ss:$8 sps:$4 sm:$0xff]   ;;  %s2956_s14 = scalar_lea.sflag [#allocation4], %s4084_s16 }
  0x68   : > { %3344 = vmatprep.subr.bf16.mxu1 %v3458_v8  ;;  %1831 = vmatprep.subr.bf16.mxu0 %v3458_v8  ;;  %v351_v41 = vld [vmem:[%s4088_s30 + $0x260] sm:$0xff]  ;;  %v3509_v63 = vld [vmem:[#allocation5 + $0x250] ss:$8 sps:$4 sm:$0xff]   ;;  %v3520_v6 = vld [vmem:[#allocation5 + $0x134] ss:$8 sps:$4 sm:$0xff]   ;;  %s3846_s22 = scalar_lea.vmem %s4971_s6, 4096 }
  0x69   : > { %v283_v42 = vld [vmem:[%s4088_s30 + $0x40] sm:$0xff]  ;;  %v3148_v50 = vcombine.high %v347_v40, %v351_v41  ;;  %v3147_v59 = vcombine.low %v347_v40, %v351_v41  ;;  %v3523_v7 = vld [vmem:[#allocation5 + $0x234] ss:$8 sps:$4 sm:$0xff]   ;;  %v3518_v14 = vld [vmem:[#allocation5 + $0x130] ss:$8 sps:$4 sm:$0xff]   ;;  %p3847_p11 = scmp.ne.s32.totalorder %s4971_s6, %s3846_s22  ;;  %p5204_p10 = scmp.ne.s32.totalorder %s5033_s23, 0 }
  0x6a   : > { %v287_v45 = vld [vmem:[%s4088_s30 + $0x60] sm:$0xff]  ;;  %v3521_v15 = vld [vmem:[#allocation5 + $0x230] ss:$8 sps:$4 sm:$0xff]   ;;  %s3924_s17 = smov [#allocation8]  }
  0x6b   : > { %3360 = vmatpush1.bf16.msra.mxu1 %v3460_v9  ;;  %1832 = vmatpush1.bf16.msra.mxu0 %v3460_v9  ;;  %v3502_v48 = vld [vmem:[#allocation5 + $0x164] ss:$8 sps:$4 sm:$0xff]   ;;  %v3084_v51 = vcombine.high %v283_v42, %v287_v45  ;;  %v3500_v52 = vld [vmem:[#allocation5 + $0x160] ss:$8 sps:$4 sm:$0xff]   ;;  %v3083_v60 = vcombine.low %v283_v42, %v287_v45  ;;  %p3848_p1 = pnand %p3847_p11, %p5204_p10  ;;  %s3850_s29 = sshll.u32 %s3924_s17, 4  ;;  %s3851_s29 = int_to_ptr.vmem [resolvable:$false] %s3850_s29 }
  0x6c   : > { %3345 = vmatprep.subr.bf16.mxu1 %v3461_v10  ;;  %1833 = vmatprep.subr.bf16.mxu0 %v3461_v10  ;;  %v3505_v49 = vld [vmem:[#allocation5 + $0x264] ss:$8 sps:$4 sm:$0xff]   ;;  %v3503_v53 = vld [vmem:[#allocation5 + $0x260] ss:$8 sps:$4 sm:$0xff]   ;;  %p3853_p6 = scmp.lt.s32.totalorder %s4971_s6, %s3851_s29 }
  0x6d   : > { %v355_v57 = vld [vmem:[%s4088_s30 + $0x280] sm:$0xff]  ;;  %p3849_p2 = pneg %p3848_p1 }
  0x6e   : > { %v359_v58 = vld [vmem:[%s4088_s30 + $0x2a0] sm:$0xff] }
  0x6f   : > { %3361 = vmatpush1.bf16.msra.mxu1 %v3463_v11  ;;  %1834 = vmatpush1.bf16.msra.mxu0 %v3463_v11  ;;  %v291_v61 = vld [vmem:[%s4088_s30 + $0x80] sm:$0xff]  ;;  %v3156_v2 = vcombine.high %v355_v57, %v359_v58  ;;  %v3155_v11 = vcombine.low %v355_v57, %v359_v58 }
  0x70   : > { %3346 = vmatprep.subr.bf16.mxu1 %v3464_v12  ;;  %1835 = vmatprep.subr.bf16.mxu0 %v3464_v12  ;;  %v295_v62 = vld [vmem:[%s4088_s30 + $0xa0] sm:$0xff] }
  0x71   : > { %v3514_v0 = vld [vmem:[#allocation5 + $0x144] ss:$8 sps:$4 sm:$0xff]   ;;  %v3092_v3 = vcombine.high %v291_v61, %v295_v62  ;;  %v3512_v4 = vld [vmem:[#allocation5 + $0x140] ss:$8 sps:$4 sm:$0xff]   ;;  %v3091_v12 = vcombine.low %v291_v61, %v295_v62  ;;  %v3554_v62 = vld [vmem:[#allocation5 + $0x1d0] ss:$8 sps:$4 sm:$0xff]  }
  0x72   : > { %v3517_v1 = vld [vmem:[#allocation5 + $0x244] ss:$8 sps:$4 sm:$0xff]   ;;  %v3515_v5 = vld [vmem:[#allocation5 + $0x240] ss:$8 sps:$4 sm:$0xff]  }
  0x73   : > { %3362 = vmatpush1.bf16.msra.mxu1 %v3466_v16  ;;  %1836 = vmatpush1.bf16.msra.mxu0 %v3466_v16  ;;  %v363_v8 = vld [vmem:[%s4088_s30 + $0x2c0] sm:$0xff] }
  0x74   : > { %3347 = vmatprep.subr.bf16.mxu1 %v3467_v19  ;;  %1837 = vmatprep.subr.bf16.mxu0 %v3467_v19  ;;  %v367_v9 = vld [vmem:[%s4088_s30 + $0x2e0] sm:$0xff] }
  0x75   : > { %v299_v10 = vld [vmem:[%s4088_s30 + $0xc0] sm:$0xff]  ;;  %v3164_v18 = vcombine.high %v363_v8, %v367_v9 }
  0x76   : > { %v303_v13 = vld [vmem:[%s4088_s30 + $0xe0] sm:$0xff] }
  0x77   : > { %3363 = vmatpush1.bf16.msra.mxu1 %v3469_v21  ;;  %1838 = vmatpush1.bf16.msra.mxu0 %v3469_v21  ;;  %v3526_v16 = vld [vmem:[#allocation5 + $0x124] ss:$8 sps:$4 sm:$0xff]   ;;  %v3100_v19 = vcombine.high %v299_v10, %v303_v13  ;;  %v3524_v20 = vld [vmem:[#allocation5 + $0x120] ss:$8 sps:$4 sm:$0xff]  }
  0x78   : > { %3348 = vmatprep.subr.bf16.mxu1 %v3470_v22  ;;  %1839 = vmatprep.subr.bf16.mxu0 %v3470_v22  ;;  %v3529_v17 = vld [vmem:[#allocation5 + $0x224] ss:$8 sps:$4 sm:$0xff]   ;;  %v3527_v21 = vld [vmem:[#allocation5 + $0x220] ss:$8 sps:$4 sm:$0xff]   ;;  %v3532_v22 = vld [vmem:[#allocation5 + $0x114] ss:$8 sps:$4 sm:$0xff]  }
  0x79   : > { %v379_v40 = vld [vmem:[%s4088_s30 + $0x340] sm:$0xff] }
  0x7a   : > { %v383_v41 = vld [vmem:[%s4088_s30 + $0x360] sm:$0xff] }
  0x7b   : > { %3364 = vmatpush2.bf16.msra.mxu1 %v3472_v23  ;;  %1840 = vmatpush2.bf16.msra.mxu0 %v3472_v23  ;;  %v3535_v23 = vld [vmem:[#allocation5 + $0x214] ss:$8 sps:$4 sm:$0xff]   ;;  %v315_v42 = vld [vmem:[%s4088_s30 + $0x140] sm:$0xff] }
  0x7c   : > { %3349 = vmatprep.subr.bf16.mxu1 %v3473_v24  ;;  %1841 = vmatprep.subr.bf16.mxu0 %v3473_v24  ;;  %v371_v24 = vld [vmem:[%s4088_s30 + $0x300] sm:$0xff] }
  0x7d   : > { %v319_v45 = vld [vmem:[%s4088_s30 + $0x160] sm:$0xff] }
  0x7e   : > { %v391_v57 = vld [vmem:[%s4088_s30 + $0x3a0] sm:$0xff] }
  0x7f   : > { %3365 = vmatpush2.bf16.msra.mxu1 %v3475_v25  ;;  %1842 = vmatpush2.bf16.msra.mxu0 %v3475_v25  ;;  %v375_v25 = vld [vmem:[%s4088_s30 + $0x320] sm:$0xff] }
  0x80   : > { %3350 = vmatprep.subr.bf16.mxu1 %v3476_v26  ;;  %1843 = vmatprep.subr.bf16.mxu0 %v3476_v26  ;;  %v307_v26 = vld [vmem:[%s4088_s30 + $0x100] sm:$0xff] }
  0x81   : > { %v323_v58 = vld [vmem:[%s4088_s30 + $0x180] sm:$0xff] }
  0x82   : > { %v327_v61 = vld [vmem:[%s4088_s30 + $0x1a0] sm:$0xff] }
  0x83   : > { %3366 = vmatpush2.bf16.msra.mxu1 %v3478_v27  ;;  %1844 = vmatpush2.bf16.msra.mxu0 %v3478_v27  ;;  %v3163_v27 = vcombine.low %v363_v8, %v367_v9  ;;  %v395_v8 = vld [vmem:[%s4088_s30 + $0x3c0] sm:$0xff] }
  0x84   : > { %3351 = vmatprep.subr.bf16.mxu1 %v3479_v28  ;;  %1845 = vmatprep.subr.bf16.mxu0 %v3479_v28  ;;  %v3099_v28 = vcombine.low %v299_v10, %v303_v13  ;;  %v399_v9 = vld [vmem:[%s4088_s30 + $0x3e0] sm:$0xff] }
  0x85   : > { %v331_v10 = vld [vmem:[%s4088_s30 + $0x1c0] sm:$0xff] }
  0x86   : > { %v335_v13 = vld [vmem:[%s4088_s30 + $0x1e0] sm:$0xff] }
  0x87   : > { %3367 = vmatpush2.bf16.msra.mxu1 %v3481_v29  ;;  %1846 = vmatpush2.bf16.msra.mxu0 %v3481_v29  ;;  %v311_v29 = vld [vmem:[%s4088_s30 + $0x120] sm:$0xff] }
  0x88   : > { %3352 = vmatprep.subr.bf16.mxu1 %v3482_v30  ;;  %1847 = vmatprep.subr.bf16.mxu0 %v3482_v30  ;;  %v3530_v30 = vld [vmem:[#allocation5 + $0x110] ss:$8 sps:$4 sm:$0xff]  }
  0x8b   : > { %3368 = vmatpush2.bf16.msra.mxu1 %v3484_v31  ;;  %1848 = vmatpush2.bf16.msra.mxu0 %v3484_v31  ;;  %v3533_v31 = vld [vmem:[#allocation5 + $0x210] ss:$8 sps:$4 sm:$0xff]  }
  0x8c   : > { %3353 = vmatprep.subr.bf16.mxu1 %v3485_v32  ;;  %1849 = vmatprep.subr.bf16.mxu0 %v3485_v32  ;;  %v3538_v32 = vld [vmem:[#allocation5 + $0x104] ss:$8 sps:$4 sm:$0xff]  }
  0x8f   : > { %3369 = vmatpush2.bf16.msra.mxu1 %v3487_v33  ;;  %1850 = vmatpush2.bf16.msra.mxu0 %v3487_v33  ;;  %v3541_v33 = vld [vmem:[#allocation5 + $0x204] ss:$8 sps:$4 sm:$0xff]  }
  0x90   : > { %3354 = vmatprep.subr.bf16.mxu1 %v3488_v34  ;;  %1851 = vmatprep.subr.bf16.mxu0 %v3488_v34  ;;  %v3172_v34 = vcombine.high %v371_v24, %v375_v25 }
  0x93   : > { %3370 = vmatpush2.bf16.msra.mxu1 %v3490_v35  ;;  %1852 = vmatpush2.bf16.msra.mxu0 %v3490_v35  ;;  %v3108_v35 = vcombine.high %v307_v26, %v311_v29 }
  0x94   : > { %3355 = vmatprep.subr.bf16.mxu1 %v3491_v36  ;;  %1853 = vmatprep.subr.bf16.mxu0 %v3491_v36  ;;  %v3536_v36 = vld [vmem:[#allocation5 + $0x100] ss:$8 sps:$4 sm:$0xff]  }
  0x97   : > { %3371 = vmatpush2.bf16.msra.mxu1 %v3493_v37  ;;  %1854 = vmatpush2.bf16.msra.mxu0 %v3493_v37  ;;  %v3539_v37 = vld [vmem:[#allocation5 + $0x200] ss:$8 sps:$4 sm:$0xff]  }
  0x98   : > { %2016 = vmatprep.subr.bf16.mxu1 %v3496_v38  ;;  %2209 = vmatprep.subr.bf16.mxu0 %v3499_v39  ;;  %v3544_v38 = vld [vmem:[#allocation5 + $0x1f4] ss:$8 sps:$4 sm:$0xff]  }
  0x99   : > { %v3547_v39 = vld [vmem:[#allocation5 + $0x2f4] ss:$8 sps:$4 sm:$0xff]  }
  0x9a   : > { %1936 = vmatmul.mubr.bf16.vlgmr.msra.gmra.mxu1 %v3139_v43  ;;  %1856 = vmatmul.mubr.bf16.vlgmr.msra.gmra.mxu0 %v3075_v44  ;;  %v3171_v43 = vcombine.low %v371_v24, %v375_v25  ;;  %v3107_v44 = vcombine.low %v307_v26, %v311_v29  ;;  %v276_v24 = vld [vmem:[%s4088_s30 + $0x8] sm:$0xff]  ;;  %v3195_v25 = vcombine.low %v395_v8, %v399_v9  ;;  %v281_v29 = vld [vmem:[%s4088_s30 + $0x30] sm:$0xff] }
  0x9b   : > { %2017 = vmatpush1.bf16.msra.mxu1 %v3494_v46  ;;  %2210 = vmatpush1.bf16.msra.mxu0 %v3497_v47  ;;  %v3542_v46 = vld [vmem:[#allocation5 + $0x1f0] ss:$8 sps:$4 sm:$0xff]   ;;  %v3131_v26 = vcombine.low %v331_v10, %v335_v13 }
  0x9c   : > { %2018 = vmatprep.subr.bf16.mxu1 %v3502_v48  ;;  %2211 = vmatprep.subr.bf16.mxu0 %v3505_v49  ;;  %v3545_v47 = vld [vmem:[#allocation5 + $0x2f0] ss:$8 sps:$4 sm:$0xff]   ;;  %v3550_v48 = vld [vmem:[#allocation5 + $0x1e4] ss:$8 sps:$4 sm:$0xff]  }
  0x9d   : > { %1945 = vmatprep.mubr.bf16.mxu1 %v3148_v50  ;;  %1865 = vmatprep.mubr.bf16.mxu0 %v3084_v51  ;;  %v3553_v49 = vld [vmem:[#allocation5 + $0x2e4] ss:$8 sps:$4 sm:$0xff]   ;;  %v3180_v50 = vcombine.high %v379_v40, %v383_v41  ;;  %v3116_v51 = vcombine.high %v315_v42, %v319_v45 }
  0x9f   : > { %2019 = vmatpush1.bf16.msra.mxu1 %v3500_v52  ;;  %2212 = vmatpush1.bf16.msra.mxu0 %v3503_v53  ;;  %v3548_v52 = vld [vmem:[#allocation5 + $0x1e0] ss:$8 sps:$4 sm:$0xff]  }
  0xa0   : > { %2020 = vmatprep.subr.bf16.mxu1 %v3508_v54  ;;  %2213 = vmatprep.subr.bf16.mxu0 %v3511_v55  ;;  %v3551_v53 = vld [vmem:[#allocation5 + $0x2e0] ss:$8 sps:$4 sm:$0xff]   ;;  %v3556_v54 = vld [vmem:[#allocation5 + $0x1d4] ss:$8 sps:$4 sm:$0xff]  }
  0xa1   : > { %v3559_v55 = vld [vmem:[#allocation5 + $0x2d4] ss:$8 sps:$4 sm:$0xff]  }
  0xa2   : > { %1946 = vmatmul.mubr.bf16.gmra.mxu1 %v3147_v59  ;;  %1866 = vmatmul.mubr.bf16.gmra.mxu0 %v3083_v60  ;;  %v3179_v59 = vcombine.low %v379_v40, %v383_v41  ;;  %v3115_v60 = vcombine.low %v315_v42, %v319_v45  ;;  %v288_v40 = vld [vmem:[%s4088_s30 + $0x68] sm:$0xff]  ;;  %v285_v41 = vld [vmem:[%s4088_s30 + $0x50] sm:$0xff] }
  0xa3   : > { %2021 = vmatpush1.bf16.msra.mxu1 %v3506_v56  ;;  %2214 = vmatpush1.bf16.msra.mxu0 %v3509_v63  ;;  %v387_v56 = vld [vmem:[%s4088_s30 + $0x380] sm:$0xff]  ;;  %v3557_v63 = vld [vmem:[#allocation5 + $0x2d0] ss:$8 sps:$4 sm:$0xff]  }
  0xa4   : > { %2022 = vmatprep.subr.bf16.mxu1 %v3514_v0  ;;  %2215 = vmatprep.subr.bf16.mxu0 %v3517_v1  ;;  %v3562_v0 = vld [vmem:[#allocation5 + $0x1c4] ss:$8 sps:$4 sm:$0xff]   ;;  %v289_v42 = vld [vmem:[%s4088_s30 + $0x70] sm:$0xff] }
  0xa5   : > { %1955 = vmatprep.mubr.bf16.mxu1 %v3156_v2  ;;  %1875 = vmatprep.mubr.bf16.mxu0 %v3092_v3  ;;  %v3565_v1 = vld [vmem:[#allocation5 + $0x2c4] ss:$8 sps:$4 sm:$0xff]   ;;  %v3188_v2 = vcombine.high %v387_v56, %v391_v57  ;;  %v3124_v3 = vcombine.high %v323_v58, %v327_v61  ;;  %v3590_v45 = vld [vmem:[#allocation5 + $0x370] ss:$8 sps:$4 sm:$0xff]  }
  0xa7   : > { %2023 = vmatpush1.bf16.msra.mxu1 %v3512_v4  ;;  %2216 = vmatpush1.bf16.msra.mxu0 %v3515_v5  ;;  %v3560_v4 = vld [vmem:[#allocation5 + $0x1c0] ss:$8 sps:$4 sm:$0xff]  }
  0xa8   : > { %2024 = vmatprep.subr.bf16.mxu1 %v3520_v6  ;;  %2217 = vmatprep.subr.bf16.mxu0 %v3523_v7  ;;  %v3563_v5 = vld [vmem:[#allocation5 + $0x2c0] ss:$8 sps:$4 sm:$0xff]   ;;  %v3568_v6 = vld [vmem:[#allocation5 + $0x1b4] ss:$8 sps:$4 sm:$0xff]  }
  0xa9   : > { %v3571_v7 = vld [vmem:[#allocation5 + $0x2b4] ss:$8 sps:$4 sm:$0xff]  }
  0xaa   : > { %1956 = vmatmul.mubr.bf16.gmra.mxu1 %v3155_v11  ;;  %1876 = vmatmul.mubr.bf16.gmra.mxu0 %v3091_v12  ;;  %v3187_v11 = vcombine.low %v387_v56, %v391_v57  ;;  %v3123_v12 = vcombine.low %v323_v58, %v327_v61  ;;  %v3087_v56 = vcombine.low %v285_v41, %v289_v42  ;;  %v300_v61 = vld [vmem:[%s4088_s30 + $0xc8] sm:$0xff] }
  0xab   : > { %2025 = vmatpush1.bf16.msra.mxu1 %v3518_v14  ;;  %2218 = vmatpush1.bf16.msra.mxu0 %v3521_v15  ;;  %v3566_v14 = vld [vmem:[#allocation5 + $0x1b0] ss:$8 sps:$4 sm:$0xff]  }
  0xac   : > { %2026 = vmatprep.subr.bf16.mxu1 %v3526_v16  ;;  %2219 = vmatprep.subr.bf16.mxu0 %v3529_v17  ;;  %v3569_v15 = vld [vmem:[#allocation5 + $0x2b0] ss:$8 sps:$4 sm:$0xff]   ;;  %v3574_v16 = vld [vmem:[#allocation5 + $0x1a4] ss:$8 sps:$4 sm:$0xff]  }
  0xad   : > { %1965 = vmatprep.mubr.bf16.mxu1 %v3164_v18  ;;  %1885 = vmatprep.mubr.bf16.mxu0 %v3100_v19  ;;  %v3577_v17 = vld [vmem:[#allocation5 + $0x2a4] ss:$8 sps:$4 sm:$0xff]   ;;  %v3196_v18 = vcombine.high %v395_v8, %v399_v9  ;;  %v3132_v19 = vcombine.high %v331_v10, %v335_v13  ;;  %v3605_v13 = vld [vmem:[#allocation5 + $0x320] ss:$8 sps:$4 sm:$0xff]  }
  0xae   : > { %v3607_v8 = vld [vmem:[#allocation5 + $0x324] ss:$8 sps:$4 sm:$0xff]  }
  0xaf   : > { %2027 = vmatpush1.bf16.msra.mxu1 %v3524_v20  ;;  %2220 = vmatpush1.bf16.msra.mxu0 %v3527_v21  ;;  %v3572_v20 = vld [vmem:[#allocation5 + $0x1a0] ss:$8 sps:$4 sm:$0xff]  }
  0xb0   : > { %2028 = vmatprep.subr.bf16.mxu1 %v3532_v22  ;;  %2221 = vmatprep.subr.bf16.mxu0 %v3535_v23  ;;  %v3575_v21 = vld [vmem:[#allocation5 + $0x2a0] ss:$8 sps:$4 sm:$0xff]   ;;  %v3580_v22 = vld [vmem:[#allocation5 + $0x194] ss:$8 sps:$4 sm:$0xff]  }
  0xb1   : > { %v3583_v23 = vld [vmem:[#allocation5 + $0x294] ss:$8 sps:$4 sm:$0xff]   ;;  %v308_v9 = vld [vmem:[%s4088_s30 + $0x108] sm:$0xff] }
  0xb2   : > { %1966 = vmatmul.mubr.bf16.gmra.mxu1 %v3163_v27  ;;  %1886 = vmatmul.mubr.bf16.gmra.mxu0 %v3099_v28  ;;  %v280_v27 = vld [vmem:[%s4088_s30 + $0x28] sm:$0xff]  ;;  %v277_v28 = vld [vmem:[%s4088_s30 + $0x10] sm:$0xff] }
  0xb3   : > { %2029 = vmatpush1.bf16.msra.mxu1 %v3530_v30  ;;  %2222 = vmatpush1.bf16.msra.mxu0 %v3533_v31  ;;  %v3578_v30 = vld [vmem:[#allocation5 + $0x190] ss:$8 sps:$4 sm:$0xff]   ;;  %v312_v10 = vld [vmem:[%s4088_s30 + $0x128] sm:$0xff] }
  0xb4   : > { %2030 = vmatprep.subr.bf16.mxu1 %v3538_v32  ;;  %2223 = vmatprep.subr.bf16.mxu0 %v3541_v33  ;;  %v3581_v31 = vld [vmem:[#allocation5 + $0x290] ss:$8 sps:$4 sm:$0xff]   ;;  %v3586_v32 = vld [vmem:[#allocation5 + $0x184] ss:$8 sps:$4 sm:$0xff]  }
  0xb5   : > { %1975 = vmatprep.mubr.bf16.mxu1 %v3172_v34  ;;  %1895 = vmatprep.mubr.bf16.mxu0 %v3108_v35  ;;  %v3589_v33 = vld [vmem:[#allocation5 + $0x284] ss:$8 sps:$4 sm:$0xff]   ;;  %v3078_v34 = vcombine.high %v276_v24, %v280_v27  ;;  %v3080_v35 = vcombine.high %v277_v28, %v281_v29 }
  0xb7   : > { %2031 = vmatpush1.bf16.msra.mxu1 %v3536_v36  ;;  %2224 = vmatpush1.bf16.msra.mxu0 %v3539_v37  ;;  %v3584_v36 = vld [vmem:[#allocation5 + $0x180] ss:$8 sps:$4 sm:$0xff]  }
  0xb8   : > { %2032 = vmatprep.subr.bf16.mxu1 %v3544_v38  ;;  %2225 = vmatprep.subr.bf16.mxu0 %v3547_v39  ;;  %v3587_v37 = vld [vmem:[#allocation5 + $0x280] ss:$8 sps:$4 sm:$0xff]   ;;  %v3592_v38 = vld [vmem:[#allocation5 + $0x374] ss:$8 sps:$4 sm:$0xff]  }
  0xb9   : > { %v284_v39 = vld [vmem:[%s4088_s30 + $0x48] sm:$0xff] }
  0xba   : > { %1976 = vmatmul.mubr.bf16.gmra.mxu1 %v3171_v43  ;;  %1896 = vmatmul.mubr.bf16.gmra.mxu0 %v3107_v44  ;;  %v3077_v43 = vcombine.low %v276_v24, %v280_v27  ;;  %v3079_v44 = vcombine.low %v277_v28, %v281_v29  ;;  %v321_v24 = vld [vmem:[%s4088_s30 + $0x170] sm:$0xff]  ;;  %v3109_v27 = vcombine.low %v308_v9, %v312_v10 }
  0xbb   : > { %2033 = vmatpush2.bf16.msra.mxu1 %v3542_v46  ;;  %2226 = vmatpush2.bf16.msra.mxu0 %v3545_v47  ;;  %v3086_v46 = vcombine.high %v284_v39, %v288_v40  ;;  %v3595_v47 = vld [vmem:[#allocation5 + $0x364] ss:$8 sps:$4 sm:$0xff]  }
  0xbc   : > { %2034 = vmatprep.subr.bf16.mxu1 %v3550_v48  ;;  %2227 = vmatprep.subr.bf16.mxu0 %v3553_v49  ;;  %v3088_v48 = vcombine.high %v285_v41, %v289_v42  ;;  %v3593_v49 = vld [vmem:[#allocation5 + $0x360] ss:$8 sps:$4 sm:$0xff]  }
  0xbd   : > { %1985 = vmatprep.mubr.bf16.mxu1 %v3180_v50  ;;  %1905 = vmatprep.mubr.bf16.mxu0 %v3116_v51  ;;  %v292_v50 = vld [vmem:[%s4088_s30 + $0x88] sm:$0xff] }
  0xbe   : > { %v296_v51 = vld [vmem:[%s4088_s30 + $0xa8] sm:$0xff] }
  0xbf   : > { %2035 = vmatpush2.bf16.msra.mxu1 %v3548_v52  ;;  %2228 = vmatpush2.bf16.msra.mxu0 %v3551_v53  ;;  %v3598_v52 = vld [vmem:[#allocation5 + $0x354] ss:$8 sps:$4 sm:$0xff]   ;;  %v3094_v57 = vcombine.high %v292_v50, %v296_v51 }
  0xc0   : > { %2036 = vmatprep.subr.bf16.mxu1 %v3556_v54  ;;  %2229 = vmatprep.subr.bf16.mxu0 %v3559_v55  ;;  %v293_v53 = vld [vmem:[%s4088_s30 + $0x90] sm:$0xff]  ;;  %v3085_v55 = vcombine.low %v284_v39, %v288_v40 }
  0xc1   : > { %v297_v54 = vld [vmem:[%s4088_s30 + $0xb0] sm:$0xff] }
  0xc2   : > { %1986 = vmatmul.mubr.bf16.gmra.mxu1 %v3179_v59  ;;  %1906 = vmatmul.mubr.bf16.gmra.mxu0 %v3115_v60  ;;  %v3096_v58 = vcombine.high %v293_v53, %v297_v54  ;;  %v3596_v59 = vld [vmem:[#allocation5 + $0x350] ss:$8 sps:$4 sm:$0xff]   ;;  %v3601_v60 = vld [vmem:[#allocation5 + $0x344] ss:$8 sps:$4 sm:$0xff]  }
  0xc3   : > { %2037 = vmatpush2.bf16.msra.mxu1 %v3554_v62  ;;  %2230 = vmatpush2.bf16.msra.mxu0 %v3557_v63  ;;  %v304_v62 = vld [vmem:[%s4088_s30 + $0xe8] sm:$0xff] }
  0xc4   : > { %2038 = vmatprep.subr.bf16.mxu1 %v3562_v0  ;;  %2231 = vmatprep.subr.bf16.mxu0 %v3565_v1  ;;  %v3599_v63 = vld [vmem:[#allocation5 + $0x340] ss:$8 sps:$4 sm:$0xff]   ;;  %v301_v0 = vld [vmem:[%s4088_s30 + $0xd0] sm:$0xff] }
  0xc5   : > { %1995 = vmatprep.mubr.bf16.mxu1 %v3188_v2  ;;  %1915 = vmatprep.mubr.bf16.mxu0 %v3124_v3  ;;  %v305_v1 = vld [vmem:[%s4088_s30 + $0xf0] sm:$0xff]  ;;  %v3093_v3 = vcombine.low %v292_v50, %v296_v51 }
  0xc6   : > { %v3604_v2 = vld [vmem:[#allocation5 + $0x334] ss:$8 sps:$4 sm:$0xff]  }
  0xc7   : > { %2039 = vmatpush2.bf16.msra.mxu1 %v3560_v4  ;;  %2232 = vmatpush2.bf16.msra.mxu0 %v3563_v5  ;;  %v3095_v4 = vcombine.low %v293_v53, %v297_v54  ;;  %v3102_v5 = vcombine.high %v300_v61, %v304_v62  ;;  %v3628_v50 = vld [vmem:[#allocation5 + $0x3b4] ss:$8 sps:$4 sm:$0xff]  }
  0xc8   : > { %2040 = vmatprep.subr.bf16.mxu1 %v3568_v6  ;;  %2233 = vmatprep.subr.bf16.mxu0 %v3571_v7  ;;  %v3104_v6 = vcombine.high %v301_v0, %v305_v1  ;;  %v3602_v7 = vld [vmem:[#allocation5 + $0x330] ss:$8 sps:$4 sm:$0xff]  }
  0xca   : > { %1996 = vmatmul.mubr.bf16.gmra.mxu1 %v3187_v11  ;;  %1916 = vmatmul.mubr.bf16.gmra.mxu0 %v3123_v12  ;;  %v309_v11 = vld [vmem:[%s4088_s30 + $0x110] sm:$0xff] }
  0xcb   : > { %2041 = vmatpush2.bf16.msra.mxu1 %v3566_v14  ;;  %2234 = vmatpush2.bf16.msra.mxu0 %v3569_v15  ;;  %v313_v12 = vld [vmem:[%s4088_s30 + $0x130] sm:$0xff]  ;;  %v3101_v15 = vcombine.low %v300_v61, %v304_v62  ;;  %v3629_v61 = vld [vmem:[#allocation5 + $0x3a0] ss:$8 sps:$4 sm:$0xff]  }
  0xcc   : > { %2042 = vmatprep.subr.bf16.mxu1 %v3574_v16  ;;  %2235 = vmatprep.subr.bf16.mxu0 %v3577_v17  ;;  %v3610_v14 = vld [vmem:[#allocation5 + $0x314] ss:$8 sps:$4 sm:$0xff]   ;;  %v3103_v16 = vcombine.low %v301_v0, %v305_v1  ;;  %v3110_v17 = vcombine.high %v308_v9, %v312_v10  ;;  %v3111_v28 = vcombine.low %v309_v11, %v313_v12  ;;  %v3635_v9 = vld [vmem:[#allocation5 + $0x380] ss:$8 sps:$4 sm:$0xff]  }
  0xcd   : > { %2005 = vmatprep.mubr.bf16.mxu1 %v3196_v18  ;;  %1925 = vmatprep.mubr.bf16.mxu0 %v3132_v19  ;;  %v3112_v18 = vcombine.high %v309_v11, %v313_v12  ;;  %v3608_v19 = vld [vmem:[#allocation5 + $0x310] ss:$8 sps:$4 sm:$0xff]   ;;  %v3634_v62 = vld [vmem:[#allocation5 + $0x394] ss:$8 sps:$4 sm:$0xff]  }
  0xcf   : > { %2043 = vmatpush2.bf16.msra.mxu1 %v3572_v20  ;;  %2236 = vmatpush2.bf16.msra.mxu0 %v3575_v21  ;;  %v3613_v20 = vld [vmem:[#allocation5 + $0x304] ss:$8 sps:$4 sm:$0xff]  }
  0xd0   : > { %2044 = vmatprep.subr.bf16.mxu1 %v3580_v22  ;;  %2237 = vmatprep.subr.bf16.mxu0 %v3583_v23  ;;  %v316_v21 = vld [vmem:[%s4088_s30 + $0x148] sm:$0xff]  ;;  %v317_v23 = vld [vmem:[%s4088_s30 + $0x150] sm:$0xff] }
  0xd1   : > { %v320_v22 = vld [vmem:[%s4088_s30 + $0x168] sm:$0xff]  ;;  %v3119_v40 = vcombine.low %v317_v23, %v321_v24 }
  0xd2   : > { %2006 = vmatmul.mubr.bf16.gmra.mxu1 %v3195_v25  ;;  %1926 = vmatmul.mubr.bf16.gmra.mxu0 %v3131_v26  ;;  %v3611_v25 = vld [vmem:[#allocation5 + $0x300] ss:$8 sps:$4 sm:$0xff]   ;;  %v3616_v26 = vld [vmem:[#allocation5 + $0x3f4] ss:$8 sps:$4 sm:$0xff]   ;;  %v3118_v29 = vcombine.high %v316_v21, %v320_v22  ;;  %v3117_v39 = vcombine.low %v316_v21, %v320_v22 }
  0xd3   : > { %2045 = vmatpush2.bf16.msra.mxu1 %v3578_v30  ;;  %2238 = vmatpush2.bf16.msra.mxu0 %v3581_v31  ;;  %v3120_v30 = vcombine.high %v317_v23, %v321_v24  ;;  %v3614_v31 = vld [vmem:[#allocation5 + $0x3f0] ss:$8 sps:$4 sm:$0xff]   ;;  %v364_v22 = vld [vmem:[%s4088_s30 + $0x2c8] sm:$0xff] }
  0xd4   : > { %2046 = vmatprep.subr.bf16.mxu1 %v3586_v32  ;;  %2239 = vmatprep.subr.bf16.mxu0 %v3589_v33  ;;  %v3619_v32 = vld [vmem:[#allocation5 + $0x3e4] ss:$8 sps:$4 sm:$0xff]   ;;  %v365_v24 = vld [vmem:[%s4088_s30 + $0x2d0] sm:$0xff] }
  0xd5   : > { %2048 = vmatprep.mubr.bf16.mxu1 %v3078_v34  ;;  %2241 = vmatprep.mubr.bf16.mxu0 %v3080_v35  ;;  %v324_v33 = vld [vmem:[%s4088_s30 + $0x188] sm:$0xff]  ;;  %v325_v35 = vld [vmem:[%s4088_s30 + $0x190] sm:$0xff] }
  0xd6   : > { %v328_v34 = vld [vmem:[%s4088_s30 + $0x1a8] sm:$0xff] }
  0xd7   : > { %2047 = vmatpush2.bf16.msra.mxu1 %v3584_v36  ;;  %2240 = vmatpush2.bf16.msra.mxu0 %v3587_v37  ;;  %v329_v36 = vld [vmem:[%s4088_s30 + $0x1b0] sm:$0xff]  ;;  %v3617_v37 = vld [vmem:[#allocation5 + $0x3e0] ss:$8 sps:$4 sm:$0xff]   ;;  %v3126_v41 = vcombine.high %v324_v33, %v328_v34  ;;  %v3125_v51 = vcombine.low %v324_v33, %v328_v34 }
  0xd8   : > { %2402 = vmatprep.subr.bf16.mxu1 %v3592_v38  ;;  %v3622_v38 = vld [vmem:[#allocation5 + $0x3d4] ss:$8 sps:$4 sm:$0xff]   ;;  %v3128_v42 = vcombine.high %v325_v35, %v329_v36  ;;  %v368_v23 = vld [vmem:[%s4088_s30 + $0x2e8] sm:$0xff] }
  0xd9   : > { %v377_v33 = vld [vmem:[%s4088_s30 + $0x330] sm:$0xff]  ;;  %v3165_v34 = vcombine.low %v364_v22, %v368_v23 }
  0xda   : > { %2049 = vmatmul.mubr.bf16.vlgmr.msra.gmra.mxu1 %v3077_v43  ;;  %2242 = vmatmul.mubr.bf16.vlgmr.msra.gmra.mxu0 %v3079_v44  ;;  %v3620_v43 = vld [vmem:[#allocation5 + $0x3d0] ss:$8 sps:$4 sm:$0xff]   ;;  %v3625_v44 = vld [vmem:[#allocation5 + $0x3c4] ss:$8 sps:$4 sm:$0xff]  }
  0xdb   : > { %2403 = vmatpush1.bf16.msra.mxu1 %v3590_v45  ;;  %2058 = vmatprep.mubr.bf16.mxu1 %v3086_v46  ;;  %v332_v45 = vld [vmem:[%s4088_s30 + $0x1c8] sm:$0xff] }
  0xdc   : > { %2404 = vmatprep.subr.bf16.mxu1 %v3595_v47  ;;  %2251 = vmatprep.mubr.bf16.mxu0 %v3088_v48  ;;  %v336_v46 = vld [vmem:[%s4088_s30 + $0x1e8] sm:$0xff]  ;;  %v333_v47 = vld [vmem:[%s4088_s30 + $0x1d0] sm:$0xff] }
  0xdd   : > { %v337_v48 = vld [vmem:[%s4088_s30 + $0x1f0] sm:$0xff]  ;;  %v3134_v53 = vcombine.high %v332_v45, %v336_v46 }
  0xde   : > { %v3136_v54 = vcombine.high %v333_v47, %v337_v48  ;;  %v3135_v0 = vcombine.low %v333_v47, %v337_v48 }
  0xdf   : > { %2405 = vmatpush1.bf16.msra.mxu1 %v3593_v49  ;;  %v3623_v49 = vld [vmem:[#allocation5 + $0x3c0] ss:$8 sps:$4 sm:$0xff]  }
  0xe0   : > { %2406 = vmatprep.subr.bf16.mxu1 %v3598_v52  ;;  %v3127_v52 = vcombine.low %v325_v35, %v329_v36 }
  0xe2   : > { %2059 = vmatmul.mubr.bf16.gmra.mxu1 %v3085_v55  ;;  %2252 = vmatmul.mubr.bf16.gmra.mxu0 %v3087_v56  ;;  %v3626_v55 = vld [vmem:[#allocation5 + $0x3b0] ss:$8 sps:$4 sm:$0xff]   ;;  %v3631_v56 = vld [vmem:[#allocation5 + $0x3a4] ss:$8 sps:$4 sm:$0xff]  }
  0xe3   : > { %2068 = vmatprep.mubr.bf16.mxu1 %v3094_v57  ;;  %2261 = vmatprep.mubr.bf16.mxu0 %v3096_v58  ;;  %v340_v57 = vld [vmem:[%s4088_s30 + $0x208] sm:$0xff] }
  0xe4   : > { %2407 = vmatpush1.bf16.msra.mxu1 %v3596_v59  ;;  %v344_v58 = vld [vmem:[%s4088_s30 + $0x228] sm:$0xff]  ;;  %v341_v59 = vld [vmem:[%s4088_s30 + $0x210] sm:$0xff] }
  0xe5   : > { %2408 = vmatprep.subr.bf16.mxu1 %v3601_v60  ;;  %v345_v60 = vld [vmem:[%s4088_s30 + $0x230] sm:$0xff]  ;;  %v3142_v1 = vcombine.high %v340_v57, %v344_v58  ;;  %v3141_v10 = vcombine.low %v340_v57, %v344_v58 }
  0xe6   : > { %v3143_v11 = vcombine.low %v341_v59, %v345_v60 }
  0xe8   : > { %2409 = vmatpush1.bf16.msra.mxu1 %v3599_v63  ;;  %v3133_v63 = vcombine.low %v332_v45, %v336_v46 }
  0xe9   : > { %2410 = vmatprep.subr.bf16.mxu1 %v3604_v2  ;;  %v3144_v2 = vcombine.high %v341_v59, %v345_v60  ;;  %v2670_v59 = vld [vmem:[#allocation7 + $0x58] sm:$0xff]  ;;  %v396_v60 = vld [vmem:[%s4088_s30 + $0x3c8] sm:$0xff] }
  0xea   : > { %2069 = vmatmul.mubr.bf16.gmra.mxu1 %v3093_v3  ;;  %2262 = vmatmul.mubr.bf16.gmra.mxu0 %v3095_v4  ;;  %v3632_v3 = vld [vmem:[#allocation5 + $0x390] ss:$8 sps:$4 sm:$0xff]   ;;  %v3637_v4 = vld [vmem:[#allocation5 + $0x384] ss:$8 sps:$4 sm:$0xff]  }
  0xeb   : > { %2078 = vmatprep.mubr.bf16.mxu1 %v3102_v5  ;;  %2271 = vmatprep.mubr.bf16.mxu0 %v3104_v6  ;;  %v348_v5 = vld [vmem:[%s4088_s30 + $0x248] sm:$0xff] }
  0xec   : > { %2411 = vmatpush1.bf16.msra.mxu1 %v3602_v7  ;;  %v352_v6 = vld [vmem:[%s4088_s30 + $0x268] sm:$0xff]  ;;  %v349_v7 = vld [vmem:[%s4088_s30 + $0x250] sm:$0xff] }
  0xed   : > { %2412 = vmatprep.subr.bf16.mxu1 %v3607_v8  ;;  %v353_v8 = vld [vmem:[%s4088_s30 + $0x270] sm:$0xff]  ;;  %v3150_v12 = vcombine.high %v348_v5, %v352_v6 }
  0xf0   : > { %2413 = vmatpush1.bf16.msra.mxu1 %v3605_v13  ;;  %v3152_v13 = vcombine.high %v349_v7, %v353_v8 }
  0xf1   : > { %2414 = vmatprep.subr.bf16.mxu1 %v3610_v14  ;;  %v356_v14 = vld [vmem:[%s4088_s30 + $0x288] sm:$0xff] }
  0xf2   : > { %2079 = vmatmul.mubr.bf16.gmra.mxu1 %v3101_v15  ;;  %2272 = vmatmul.mubr.bf16.gmra.mxu0 %v3103_v16  ;;  %v360_v15 = vld [vmem:[%s4088_s30 + $0x2a8] sm:$0xff]  ;;  %v357_v16 = vld [vmem:[%s4088_s30 + $0x290] sm:$0xff] }
  0xf3   : > { %2088 = vmatprep.mubr.bf16.mxu1 %v3110_v17  ;;  %2281 = vmatprep.mubr.bf16.mxu0 %v3112_v18  ;;  %v361_v17 = vld [vmem:[%s4088_s30 + $0x2b0] sm:$0xff]  ;;  %v3149_v18 = vcombine.low %v348_v5, %v352_v6  ;;  %v2668_v5 = vld [vmem:[#allocation7 + $0x48] sm:$0xff]  ;;  %v533_v6 = vlaneseq }
  0xf4   : > { %2415 = vmatpush1.bf16.msra.mxu1 %v3608_v19  ;;  %v3151_v19 = vcombine.low %v349_v7, %v353_v8  ;;  %v3160_v21 = vcombine.high %v357_v16, %v361_v17  ;;  %v2667_v7 = vld [vmem:[#allocation7 + $0x40] sm:$0xff]  ;;  %v278_v8 = vld [vmem:[%s4088_s30 + $0x18] sm:$0xff] }
  0xf5   : > { %2416 = vmatprep.subr.bf16.mxu1 %v3613_v20  ;;  %v3158_v20 = vcombine.high %v356_v14, %v360_v15 }
  0xf8   : > { %2417 = vmatpush1.bf16.msra.mxu1 %v3611_v25  ;;  %v369_v25 = vld [vmem:[%s4088_s30 + $0x2f0] sm:$0xff] }
  0xf9   : > { %2418 = vmatprep.subr.bf16.mxu1 %v3616_v26  ;;  %v3157_v26 = vcombine.low %v356_v14, %v360_v15  ;;  %v3167_v35 = vcombine.low %v365_v24, %v369_v25  ;;  %v2666_v14 = vld [vmem:[#allocation7 + $0x38] sm:$0xff] }
  0xfa   : > { %2089 = vmatmul.mubr.bf16.gmra.mxu1 %v3109_v27  ;;  %2282 = vmatmul.mubr.bf16.gmra.mxu0 %v3111_v28  ;;  %v3159_v27 = vcombine.low %v357_v16, %v361_v17  ;;  %v3166_v28 = vcombine.high %v364_v22, %v368_v23  ;;  %v2665_v16 = vld [vmem:[#allocation7 + $0x30] sm:$0xff]  ;;  %v531_v17 = vld [vmem:[%s5018_s2] sm:$0x3] }
  0xfb   : > { %2098 = vmatprep.mubr.bf16.mxu1 %v3118_v29  ;;  %2291 = vmatprep.mubr.bf16.mxu0 %v3120_v30  ;;  %v3168_v29 = vcombine.high %v365_v24, %v369_v25  ;;  %v372_v30 = vld [vmem:[%s4088_s30 + $0x308] sm:$0xff] }
  0xfc   : > { %2419 = vmatpush2.bf16.msra.mxu1 %v3614_v31  ;;  %v376_v31 = vld [vmem:[%s4088_s30 + $0x328] sm:$0xff] }
  0xfd   : > { %2420 = vmatprep.subr.bf16.mxu1 %v3619_v32  ;;  %v373_v32 = vld [vmem:[%s4088_s30 + $0x310] sm:$0xff]  ;;  %v3174_v36 = vcombine.high %v372_v30, %v376_v31  ;;  %v3173_v45 = vcombine.low %v372_v30, %v376_v31  ;;  %v2664_v24 = vld [vmem:[#allocation7 + $0x28] sm:$0xff] }
  0xfe   : > { %v3175_v46 = vcombine.low %v373_v32, %v377_v33 }
 0x100   : > { %2421 = vmatpush2.bf16.msra.mxu1 %v3617_v37  ;;  %v3176_v37 = vcombine.high %v373_v32, %v377_v33  ;;  %v294_v32 = vld [vmem:[%s4088_s30 + $0x98] sm:$0xff] }
 0x101   : > { %2422 = vmatprep.subr.bf16.mxu1 %v3622_v38  ;;  %v2674_v38 = vld [vmem:[#allocation7 + $0x78] sm:$0xff] }
 0x102   : > { %2099 = vmatmul.mubr.bf16.gmra.mxu1 %v3117_v39  ;;  %2292 = vmatmul.mubr.bf16.gmra.mxu0 %v3119_v40  ;;  %v5026_v39 = vmov 0.0   ;;  %v380_v40 = vld [vmem:[%s4088_s30 + $0x348] sm:$0xff]  ;;  %v298_v33 = vld [vmem:[%s4088_s30 + $0xb8] sm:$0xff] }
 0x103   : > { %2108 = vmatprep.mubr.bf16.mxu1 %v3126_v41  ;;  %2301 = vmatprep.mubr.bf16.mxu0 %v3128_v42  ;;  %v2673_v41 = vld [vmem:[#allocation7 + $0x70] sm:$0xff]  ;;  %v384_v42 = vld [vmem:[%s4088_s30 + $0x368] sm:$0xff] }
 0x104   : > { %2423 = vmatpush2.bf16.msra.mxu1 %v3620_v43  ;;  %2698 = vmatprep.subr.mxu0 %v5026_v39  ;;  %v381_v43 = vld [vmem:[%s4088_s30 + $0x350] sm:$0xff]  ;;  %v3182_v47 = vcombine.high %v380_v40, %v384_v42 }
 0x105   : > { %2424 = vmatprep.subr.bf16.mxu1 %v3625_v44  ;;  %2699 = vmatpush1.msra.mxu0 %v2674_v38  ;;  %v385_v44 = vld [vmem:[%s4088_s30 + $0x370] sm:$0xff] }
 0x106   : > { %2700 = vmatprep.subr.mxu0 %v5026_v39  ;;  %v3184_v48 = vcombine.high %v381_v43, %v385_v44 }
 0x107   : > { %2701 = vmatpush1.msra.mxu0 %v2673_v41  ;;  %v2662_v41 = vld [vmem:[#allocation7 + $0x18] sm:$0xff] }
 0x108   : > { %2425 = vmatpush2.bf16.msra.mxu1 %v3623_v49  ;;  %2702 = vmatprep.subr.mxu0 %v5026_v39  ;;  %v2672_v49 = vld [vmem:[#allocation7 + $0x68] sm:$0xff] }
 0x109   : > { %2426 = vmatprep.subr.bf16.mxu1 %v3628_v50  ;;  %2703 = vmatpush1.msra.mxu0 %v2672_v49  ;;  %v388_v50 = vld [vmem:[%s4088_s30 + $0x388] sm:$0xff] }
 0x10a   : > { %2109 = vmatmul.mubr.bf16.gmra.mxu1 %v3125_v51  ;;  %2302 = vmatmul.mubr.bf16.gmra.mxu0 %v3127_v52  ;;  %v2671_v51 = vld [vmem:[#allocation7 + $0x60] sm:$0xff]  ;;  %v392_v52 = vld [vmem:[%s4088_s30 + $0x3a8] sm:$0xff] }
 0x10b   : > { %2118 = vmatprep.mubr.bf16.mxu1 %v3134_v53  ;;  %2311 = vmatprep.mubr.bf16.mxu0 %v3136_v54  ;;  %v389_v53 = vld [vmem:[%s4088_s30 + $0x390] sm:$0xff]  ;;  %v3190_v57 = vcombine.high %v388_v50, %v392_v52 }
 0x10c   : > { %2427 = vmatpush2.bf16.msra.mxu1 %v3626_v55  ;;  %2704 = vmatprep.subr.mxu0 %v5026_v39  ;;  %v393_v54 = vld [vmem:[%s4088_s30 + $0x3b0] sm:$0xff]  ;;  %v3181_v55 = vcombine.low %v380_v40, %v384_v42  ;;  %v3098_v40 = vcombine.high %v294_v32, %v298_v33 }
 0x10d   : > { %2428 = vmatprep.subr.bf16.mxu1 %v3631_v56  ;;  %2705 = vmatpush1.msra.mxu0 %v2671_v51  ;;  %v3183_v56 = vcombine.low %v381_v43, %v385_v44  ;;  %v3192_v58 = vcombine.high %v389_v53, %v393_v54  ;;  %v302_v51 = vld [vmem:[%s4088_s30 + $0xd8] sm:$0xff] }
 0x10e   : > { %2706 = vmatprep.subr.mxu0 %v5026_v39 }
 0x10f   : > { %2707 = vmatpush1.msra.mxu0 %v2670_v59  ;;  %v2660_v59 = vld [vmem:[#allocation7 + $0x8] sm:$0xff] }
 0x110   : > { %2429 = vmatpush2.bf16.msra.mxu1 %v3629_v61  ;;  %2708 = vmatprep.subr.mxu0 %v5026_v39  ;;  %v2669_v61 = vld [vmem:[#allocation7 + $0x50] sm:$0xff] }
 0x111   : > { %2430 = vmatprep.subr.bf16.mxu1 %v3634_v62  ;;  %v400_v62 = vld [vmem:[%s4088_s30 + $0x3e8] sm:$0xff]  ;;  %2709 = vmatpush1.msra.mxu0 %v2669_v61 }
 0x112   : > { %2119 = vmatmul.mubr.bf16.gmra.mxu1 %v3133_v63  ;;  %2312 = vmatmul.mubr.bf16.gmra.mxu0 %v3135_v0  ;;  %v397_v63 = vld [vmem:[%s4088_s30 + $0x3d0] sm:$0xff] }
 0x113   : > { %2128 = vmatprep.mubr.bf16.mxu1 %v3142_v1  ;;  %2321 = vmatprep.mubr.bf16.mxu0 %v3144_v2  ;;  %v401_v0 = vld [vmem:[%s4088_s30 + $0x3f0] sm:$0xff]  ;;  %v3189_v1 = vcombine.low %v388_v50, %v392_v52  ;;  %v3191_v2 = vcombine.low %v389_v53, %v393_v54  ;;  %v306_v52 = vld [vmem:[%s4088_s30 + $0xf8] sm:$0xff] }
 0x114   : > { %2431 = vmatpush2.bf16.msra.mxu1 %v3632_v3  ;;  %2710 = vmatprep.subr.mxu0 %v5026_v39  ;;  %v3198_v3 = vcombine.high %v396_v60, %v400_v62 }
 0x115   : > { %2432 = vmatprep.subr.bf16.mxu1 %v3637_v4  ;;  %v3200_v4 = vcombine.high %v397_v63, %v401_v0  ;;  %2711 = vmatpush1.msra.mxu0 %v2668_v5  ;;  %v310_v5 = vld [vmem:[%s4088_s30 + $0x118] sm:$0xff] }
 0x116   : > { %2712 = vmatprep.subr.mxu0 %v5026_v39 }
 0x117   : > { %2713 = vmatpush1.msra.mxu0 %v2667_v7 }
 0x118   : > { %2433 = vmatpush2.bf16.msra.mxu1 %v3635_v9  ;;  %v282_v9 = vld [vmem:[%s4088_s30 + $0x38] sm:$0xff]  ;;  %2714 = vmatprep.subr.mxu0 %v5026_v39 }
 0x119   : > { %2715 = vmatpush1.msra.mxu0 %v2666_v14 }
 0x11a   : > { %2129 = vmatmul.mubr.bf16.gmra.mxu1 %v3141_v10  ;;  %2322 = vmatmul.mubr.bf16.gmra.mxu0 %v3143_v11  ;;  %v3197_v10 = vcombine.low %v396_v60, %v400_v62  ;;  %v3199_v11 = vcombine.low %v397_v63, %v401_v0 }
 0x11b   : > { %2138 = vmatprep.mubr.bf16.mxu1 %v3150_v12  ;;  %2331 = vmatprep.mubr.bf16.mxu0 %v3152_v13  ;;  %v3082_v12 = vcombine.high %v278_v8, %v282_v9  ;;  %v534_v13 = vshrl.u32 %v533_v6, 7  ;;  %v314_v6 = vld [vmem:[%s4088_s30 + $0x138] sm:$0xff] }
 0x11c   : > { %2716 = vmatprep.subr.mxu0 %v5026_v39 }
 0x11d   : > { %v535_v15 = vsub.s32 0, %v534_v13  ;;  %2717 = vmatpush1.msra.mxu0 %v2665_v16 }
 0x11e   : > { %2718 = vmatprep.subr.mxu0 %v5026_v39 }
 0x11f   : > { %v4228_v22 = vrot.slane %v531_v17, %v535_v15  ;;  %2719 = vmatpush1.msra.mxu0 %v2664_v24  ;;  %v318_v24 = vld [vmem:[%s4088_s30 + $0x158] sm:$0xff] }
 0x120   : > { %2720 = vmatprep.subr.mxu0 %v5026_v39 }
 0x122   : > { %2139 = vmatmul.mubr.bf16.gmra.mxu1 %v3149_v18  ;;  %2332 = vmatmul.mubr.bf16.gmra.mxu0 %v3151_v19  ;;  %v286_v18 = vld [vmem:[%s4088_s30 + $0x58] sm:$0xff] }
 0x123   : > { %2148 = vmatprep.mubr.bf16.mxu1 %v3158_v20  ;;  %2341 = vmatprep.mubr.bf16.mxu0 %v3160_v21  ;;  %v290_v19 = vld [vmem:[%s4088_s30 + $0x78] sm:$0xff]  ;;  %v539_v20 = vsub.s32 1, %v534_v13  ;;  %v3081_v21 = vcombine.low %v278_v8, %v282_v9 }
 0x124   : > { %v3090_v23 = vcombine.high %v286_v18, %v290_v19  ;;  %v2690_v13 = vld [vmem:[#allocation7 + $0xf8] sm:$0xff] }
 0x125   : > { %v4230_v25 = vrot.slane %v531_v17, %v539_v20  ;;  %v2689_v20 = vld [vmem:[#allocation7 + $0xf0] sm:$0xff] }
 0x12a   : > { %2149 = vmatmul.mubr.bf16.gmra.mxu1 %v3157_v26  ;;  %2342 = vmatmul.mubr.bf16.gmra.mxu0 %v3159_v27 }
 0x12b   : > { %2158 = vmatprep.mubr.bf16.mxu1 %v3166_v28  ;;  %2351 = vmatprep.mubr.bf16.mxu0 %v3168_v29  ;;  %v2663_v29 = vld [vmem:[#allocation7 + $0x20] sm:$0xff] }
 0x12c   : > { %2721 = vmatpush1.msra.mxu0 %v2663_v29 }
 0x12d   : > { %2722 = vmatprep.subr.mxu0 %v5026_v39 }
 0x12e   : > { %2723 = vmatpush1.msra.mxu0 %v2662_v41 }
 0x12f   : > { %2724 = vmatprep.subr.mxu0 %v5026_v39 }
 0x132   : > { %2159 = vmatmul.mubr.bf16.gmra.mxu1 %v3165_v34  ;;  %2352 = vmatmul.mubr.bf16.gmra.mxu0 %v3167_v35 }
 0x133   : > { %2168 = vmatprep.mubr.bf16.mxu1 %v3174_v36  ;;  %2361 = vmatprep.mubr.bf16.mxu0 %v3176_v37  ;;  %v3089_v37 = vcombine.low %v286_v18, %v290_v19 }
 0x13a   : > { %2169 = vmatmul.mubr.bf16.gmra.mxu1 %v3173_v45  ;;  %2362 = vmatmul.mubr.bf16.gmra.mxu0 %v3175_v46 }
 0x13b   : > { %2178 = vmatprep.mubr.bf16.mxu1 %v3182_v47  ;;  %2371 = vmatprep.mubr.bf16.mxu0 %v3184_v48  ;;  %v2661_v48 = vld [vmem:[#allocation7 + $0x10] sm:$0xff] }
 0x13c   : > { %2725 = vmatpush1.msra.mxu0 %v2661_v48 }
 0x13d   : > { %2726 = vmatprep.subr.mxu0 %v5026_v39 }
 0x13e   : > { %2727 = vmatpush1.msra.mxu0 %v2660_v59  ;;  %v330_v59 = vld [vmem:[%s4088_s30 + $0x1b8] sm:$0xff] }
 0x13f   : > { %2728 = vmatprep.subr.mxu0 %v5026_v39 }
 0x142   : > { %2179 = vmatmul.mubr.bf16.gmra.mxu1 %v3181_v55  ;;  %2372 = vmatmul.mubr.bf16.gmra.mxu0 %v3183_v56  ;;  %v3097_v56 = vcombine.low %v294_v32, %v298_v33  ;;  %v3113_v33 = vcombine.low %v310_v5, %v314_v6 }
 0x143   : > { %2188 = vmatprep.mubr.bf16.mxu1 %v3190_v57  ;;  %2381 = vmatprep.mubr.bf16.mxu0 %v3192_v58  ;;  %v3106_v58 = vcombine.high %v302_v51, %v306_v52 }
 0x14a   : > { %2189 = vmatmul.mubr.bf16.gmra.mxu1 %v3189_v1  ;;  %2382 = vmatmul.mubr.bf16.gmra.mxu0 %v3191_v2  ;;  %v2659_v2 = vld [vmem:[#allocation7] sm:$0xff] }
 0x14b   : > { %2198 = vmatprep.mubr.bf16.mxu1 %v3198_v3  ;;  %2391 = vmatprep.mubr.bf16.mxu0 %v3200_v4 }
 0x14c   : > { %2729 = vmatpush1.msra.mxu0 %v2659_v2 }
 0x14d   : > { %2730 = vmatprep.subr.mxu0 %v5026_v39 }
 0x14e   : > { %2731 = vmatpush2.msra.mxu0 %v2690_v13 }
 0x14f   : > { %2732 = vmatprep.subr.mxu0 %v5026_v39 }
 0x150   : > { %2733 = vmatpush2.msra.mxu0 %v2689_v20 }
 0x151   : > { %2734 = vmatprep.subr.mxu0 %v5026_v39 }
 0x152   : > { %2199 = vmatmul.mubr.bf16.gmra.mxu1 %v3197_v10  ;;  %2392 = vmatmul.mubr.bf16.gmra.mxu0 %v3199_v11  ;;  %v3105_v10 = vcombine.low %v302_v51, %v306_v52  ;;  %v2687_v52 = vld [vmem:[#allocation7 + $0xe0] sm:$0xff] }
 0x153   : > { %2434 = vmatprep.mubr.bf16.mxu1 %v3082_v12  ;;  %v3114_v12 = vcombine.high %v310_v5, %v314_v6 }
 0x15a   : > { %v1937_v26 = vpop.f32.mrf.mxu1  ;;  %2435 = vmatmul.mubr.bf16.vlgmr.msra.gmra.mxu1 %v3081_v21  ;;  %v4233_v27 = vpop.f32.mrf.mxu0 }
 0x15b   : > { %v4236_v28 = vadd.f32 %v1937_v26, %v4228_v22  ;;  %2444 = vmatprep.mubr.bf16.mxu1 %v3090_v23  ;;  %v322_v26 = vld [vmem:[%s4088_s30 + $0x178] sm:$0xff] }
 0x15c   : > { %v1939_v30 = vpop.f32.mrf.mxu1  ;;  %v4238_v31 = vpop.f32.mrf.mxu0 }
 0x15d   : > { %v4243_v34 = vadd.f32 %v1939_v30, %v4230_v25 }
 0x15e   : > { %v1941_v35 = vpop.f32.mrf.mxu1  ;;  %v4246_v36 = vpop.f32.mrf.mxu0 }
 0x15f   : > { %v4249_v38 = vadd.f32 %v1941_v35, %v4228_v22 }
 0x160   : > { %v1943_v42 = vpop.f32.mrf.mxu1  ;;  %v4251_v43 = vpop.f32.mrf.mxu0 }
 0x161   : > { %v4254_v44 = vadd.f32 %v1943_v42, %v4230_v25 }
 0x162   : > { %v1947_v45 = vpop.f32.mrf.mxu1  ;;  %2445 = vmatmul.mubr.bf16.gmra.mxu1 %v3089_v37  ;;  %v4257_v46 = vpop.f32.mrf.mxu0  ;;  %v3122_v37 = vcombine.high %v318_v24, %v322_v26 }
 0x163   : > { %v4260_v47 = vadd.f32 %v1947_v45, %v4228_v22  ;;  %2454 = vmatprep.mubr.bf16.mxu1 %v3098_v40  ;;  %v2688_v40 = vld [vmem:[#allocation7 + $0xe8] sm:$0xff] }
 0x164   : > { %v1949_v49 = vpop.f32.mrf.mxu1  ;;  %v4262_v50 = vpop.f32.mrf.mxu0  ;;  %2735 = vmatpush2.msra.mxu0 %v2688_v40 }
 0x165   : > { %v4267_v53 = vadd.f32 %v1949_v49, %v4230_v25  ;;  %2736 = vmatprep.subr.mxu0 %v5026_v39 }
 0x166   : > { %v1951_v54 = vpop.f32.mrf.mxu1  ;;  %v4270_v55 = vpop.f32.mrf.mxu0  ;;  %2737 = vmatpush2.msra.mxu0 %v2687_v52 }
 0x167   : > { %v4273_v57 = vadd.f32 %v1951_v54, %v4228_v22  ;;  %2738 = vmatprep.subr.mxu0 %v5026_v39 }
 0x168   : > { %v1953_v60 = vpop.f32.mrf.mxu1  ;;  %v4275_v61 = vpop.f32.mrf.mxu0 }
 0x169   : > { %5039 = vst [vmem:[#allocation12_spill] sm:$0xff] %v4275_v61  ;;  %v4278_v62 = vadd.f32 %v1953_v60, %v4230_v25 }
 0x16a   : > { %v1957_v63 = vpop.f32.mrf.mxu1  ;;  %2455 = vmatmul.mubr.bf16.gmra.mxu1 %v3097_v56  ;;  %v4281_v0 = vpop.f32.mrf.mxu0 }
 0x16b   : > { %5040 = vst [vmem:[#allocation13_spill] sm:$0xff] %v4281_v0  ;;  %v4284_v1 = vadd.f32 %v1957_v63, %v4228_v22  ;;  %2464 = vmatprep.mubr.bf16.mxu1 %v3106_v58  ;;  %v326_v58 = vld [vmem:[%s4088_s30 + $0x198] sm:$0xff] }
 0x16c   : > { %v1959_v3 = vpop.f32.mrf.mxu1  ;;  %v4286_v4 = vpop.f32.mrf.mxu0  ;;  %v3130_v6 = vcombine.high %v326_v58, %v330_v59 }
 0x16d   : > { %5041 = vst [vmem:[#allocation14_spill] sm:$0xff] %v4286_v4  ;;  %v4291_v7 = vadd.f32 %v1959_v3, %v4230_v25  ;;  %v3121_v3 = vcombine.low %v318_v24, %v322_v26 }
 0x16e   : > { %v1961_v8 = vpop.f32.mrf.mxu1  ;;  %v4294_v9 = vpop.f32.mrf.mxu0 }
 0x16f   : > { %5042 = vst [vmem:[#allocation15_spill] sm:$0xff] %v4294_v9  ;;  %v4297_v11 = vadd.f32 %v1961_v8, %v4228_v22  ;;  %v2686_v8 = vld [vmem:[#allocation7 + $0xd8] sm:$0xff] }
 0x170   : > { %v1963_v14 = vpop.f32.mrf.mxu1  ;;  %v4299_v15 = vpop.f32.mrf.mxu0  ;;  %2739 = vmatpush2.msra.mxu0 %v2686_v8 }
 0x171   : > { %5043 = vst [vmem:[#allocation16_spill] sm:$0xff] %v4299_v15  ;;  %v4302_v16 = vadd.f32 %v1963_v14, %v4230_v25  ;;  %2740 = vmatprep.subr.mxu0 %v5026_v39 }
 0x172   : > { %v1967_v17 = vpop.f32.mrf.mxu1  ;;  %2465 = vmatmul.mubr.bf16.gmra.mxu1 %v3105_v10  ;;  %v4305_v18 = vpop.f32.mrf.mxu0 }
 0x173   : > { %5044 = vst [vmem:[#allocation17_spill] sm:$0xff] %v4305_v18  ;;  %v4308_v19 = vadd.f32 %v1967_v17, %v4228_v22  ;;  %2474 = vmatprep.mubr.bf16.mxu1 %v3114_v12 }
 0x174   : > { %v1969_v21 = vpop.f32.mrf.mxu1  ;;  %v4310_v23 = vpop.f32.mrf.mxu0 }
 0x175   : > { %5045 = vst [vmem:[#allocation18_spill] sm:$0xff] %v4310_v23  ;;  %v4315_v29 = vadd.f32 %v1969_v21, %v4230_v25  ;;  %v2685_v21 = vld [vmem:[#allocation7 + $0xd0] sm:$0xff] }
 0x176   : > { %v1971_v30 = vpop.f32.mrf.mxu1  ;;  %v4318_v32 = vpop.f32.mrf.mxu0  ;;  %2741 = vmatpush2.msra.mxu0 %v2685_v21 }
 0x177   : > { %5046 = vst [vmem:[#allocation19_spill] sm:$0xff] %v4318_v32  ;;  %v4321_v35 = vadd.f32 %v1971_v30, %v4228_v22  ;;  %v334_v30 = vld [vmem:[%s4088_s30 + $0x1d8] sm:$0xff]  ;;  %2742 = vmatprep.subr.mxu0 %v5026_v39 }
 0x178   : > { %v1973_v41 = vpop.f32.mrf.mxu1  ;;  %v4323_v42 = vpop.f32.mrf.mxu0 }
 0x179   : > { %5047 = vst [vmem:[#allocation20_spill] sm:$0xff] %v4323_v42  ;;  %v4326_v45 = vadd.f32 %v1973_v41, %v4230_v25  ;;  %v2679_v42 = vld [vmem:[#allocation7 + $0xa0] sm:$0xff] }
 0x17a   : > { %v1977_v48 = vpop.f32.mrf.mxu1  ;;  %2475 = vmatmul.mubr.bf16.gmra.mxu1 %v3113_v33  ;;  %v4329_v49 = vpop.f32.mrf.mxu0  ;;  %v338_v33 = vld [vmem:[%s4088_s30 + $0x1f8] sm:$0xff] }
 0x17b   : > { %5048 = vst [vmem:[#allocation21_spill] sm:$0xff] %v4329_v49  ;;  %v4332_v51 = vadd.f32 %v1977_v48, %v4228_v22  ;;  %2484 = vmatprep.mubr.bf16.mxu1 %v3122_v37  ;;  %v3129_v48 = vcombine.low %v326_v58, %v330_v59  ;;  %v2683_v59 = vld [vmem:[#allocation7 + $0xc0] sm:$0xff]  ;;  %v362_v49 = vld [vmem:[%s4088_s30 + $0x2b8] sm:$0xff] }
 0x17c   : > { %v1979_v54 = vpop.f32.mrf.mxu1  ;;  %v4334_v56 = vpop.f32.mrf.mxu0 }
 0x17d   : > { %5049 = vst [vmem:[#allocation22_spill] sm:$0xff] %v4334_v56  ;;  %v4339_v60 = vadd.f32 %v1979_v54, %v4230_v25  ;;  %v3138_v54 = vcombine.high %v334_v30, %v338_v33 }
 0x17e   : > { %v1981_v63 = vpop.f32.mrf.mxu1  ;;  %v4342_v2 = vpop.f32.mrf.mxu0 }
 0x17f   : > { %5050 = vst [vmem:[#allocation23_spill] sm:$0xff] %v4342_v2  ;;  %v4345_v5 = vadd.f32 %v1981_v63, %v4228_v22  ;;  %v2684_v63 = vld [vmem:[#allocation7 + $0xc8] sm:$0xff] }
 0x180   : > { %v1983_v10 = vpop.f32.mrf.mxu1  ;;  %v4347_v12 = vpop.f32.mrf.mxu0  ;;  %2743 = vmatpush2.msra.mxu0 %v2684_v63  ;;  %v2680_v2 = vld [vmem:[#allocation7 + $0xa8] sm:$0xff] }
 0x181   : > { %5051 = vst [vmem:[#allocation24_spill] sm:$0xff] %v4347_v12  ;;  %v4350_v13 = vadd.f32 %v1983_v10, %v4230_v25  ;;  %2744 = vmatprep.subr.mxu0 %v5026_v39  ;;  %v350_v12 = vld [vmem:[%s4088_s30 + $0x258] sm:$0xff] }
 0x182   : > { %v1987_v14 = vpop.f32.mrf.mxu1  ;;  %2485 = vmatmul.mubr.bf16.gmra.mxu1 %v3121_v3  ;;  %v4353_v17 = vpop.f32.mrf.mxu0  ;;  %2745 = vmatpush2.msra.mxu0 %v2683_v59 }
 0x183   : > { %5052 = vst [vmem:[#allocation25_spill] sm:$0xff] %v4353_v17  ;;  %v4356_v20 = vadd.f32 %v1987_v14, %v4228_v22  ;;  %2494 = vmatprep.mubr.bf16.mxu1 %v3130_v6  ;;  %2746 = vmatprep.subr.mxu0 %v5026_v39 }
 0x184   : > { %v1989_v24 = vpop.f32.mrf.mxu1  ;;  %v4358_v26 = vpop.f32.mrf.mxu0 }
 0x185   : > { %5053 = vst [vmem:[#allocation26_spill] sm:$0xff] %v4358_v26  ;;  %v4363_v37 = vadd.f32 %v1989_v24, %v4230_v25 }
 0x186   : > { %v1991_v40 = vpop.f32.mrf.mxu1  ;;  %v4366_v41 = vpop.f32.mrf.mxu0 }
 0x187   : > { %5054 = vst [vmem:[#allocation27_spill] sm:$0xff] %v4366_v41  ;;  %v4369_v52 = vadd.f32 %v1991_v40, %v4228_v22  ;;  %v342_v40 = vld [vmem:[%s4088_s30 + $0x218] sm:$0xff] }
 0x188   : > { %v1993_v3 = vpop.f32.mrf.mxu1  ;;  %v4371_v6 = vpop.f32.mrf.mxu0  ;;  %v2682_v41 = vld [vmem:[#allocation7 + $0xb8] sm:$0xff] }
 0x189   : > { %5055 = vst [vmem:[#allocation28_spill] sm:$0xff] %v4371_v6  ;;  %v4374_v8 = vadd.f32 %v1993_v3, %v4230_v25  ;;  %v346_v6 = vld [vmem:[%s4088_s30 + $0x238] sm:$0xff]  ;;  %2747 = vmatpush2.msra.mxu0 %v2682_v41 }
 0x18a   : > { %v1997_v10 = vpop.f32.mrf.mxu1  ;;  %2495 = vmatmul.mubr.bf16.gmra.mxu1 %v3129_v48  ;;  %v4377_v14 = vpop.f32.mrf.mxu0  ;;  %2748 = vmatprep.subr.mxu0 %v5026_v39 }
 0x18b   : > { %5056 = vst [vmem:[#allocation29_spill] sm:$0xff] %v4377_v14  ;;  %v4380_v58 = vadd.f32 %v1997_v10, %v4228_v22  ;;  %2504 = vmatprep.mubr.bf16.mxu1 %v3138_v54  ;;  %v3137_v14 = vcombine.low %v334_v30, %v338_v33  ;;  %v3146_v54 = vcombine.high %v342_v40, %v346_v6  ;;  %v2681_v33 = vld [vmem:[#allocation7 + $0xb0] sm:$0xff] }
 0x18c   : > { %v1999_v21 = vpop.f32.mrf.mxu1  ;;  %v4382_v24 = vpop.f32.mrf.mxu0  ;;  %2749 = vmatpush2.msra.mxu0 %v2681_v33 }
 0x18d   : > { %5057 = vst [vmem:[#allocation30_spill] sm:$0xff] %v4382_v24  ;;  %v4387_v63 = vadd.f32 %v1999_v21, %v4230_v25  ;;  %2750 = vmatprep.subr.mxu0 %v5026_v39 }
 0x18e   : > { %v2001_v3 = vpop.f32.mrf.mxu1  ;;  %v4390_v48 = vpop.f32.mrf.mxu0  ;;  %2751 = vmatpush2.msra.mxu0 %v2680_v2 }
 0x18f   : > { %5058 = vst [vmem:[#allocation31_spill] sm:$0xff] %v4390_v48  ;;  %v4393_v10 = vadd.f32 %v2001_v3, %v4228_v22  ;;  %2752 = vmatprep.subr.mxu0 %v5026_v39 }
 0x190   : > { %v2003_v24 = vpop.f32.mrf.mxu1  ;;  %v4395_v26 = vpop.f32.mrf.mxu0  ;;  %2753 = vmatpush2.msra.mxu0 %v2679_v42  ;;  %v366_v42 = vld [vmem:[%s4088_s30 + $0x2d8] sm:$0xff] }
 0x191   : > { %5059 = vst [vmem:[#allocation32_spill] sm:$0xff] %v4395_v26  ;;  %v4398_v59 = vadd.f32 %v2003_v24, %v4230_v25  ;;  %v354_v26 = vld [vmem:[%s4088_s30 + $0x278] sm:$0xff] }
 0x192   : > { %v2007_v21 = vpop.f32.mrf.mxu1  ;;  %2505 = vmatmul.mubr.bf16.gmra.mxu1 %v3137_v14  ;;  %v4401_v48 = vpop.f32.mrf.mxu0 }
 0x193   : > { %5060 = vst [vmem:[#allocation33_spill] sm:$0xff] %v4401_v48  ;;  %v4404_v30 = vadd.f32 %v2007_v21, %v4228_v22  ;;  %2514 = vmatprep.mubr.bf16.mxu1 %v3146_v54  ;;  %v3145_v48 = vcombine.low %v342_v40, %v346_v6  ;;  %v3154_v21 = vcombine.high %v350_v12, %v354_v26 }
 0x194   : > { %v2009_v3 = vpop.f32.mrf.mxu1  ;;  %v4406_v17 = vpop.f32.mrf.mxu0 }
 0x195   : > { %5061 = vst [vmem:[#allocation34_spill] sm:$0xff] %v4406_v17  ;;  %v4411_v41 = vadd.f32 %v2009_v3, %v4230_v25 }
 0x196   : > { %v2011_v24 = vpop.f32.mrf.mxu1  ;;  %v4414_v14 = vpop.f32.mrf.mxu0 }
 0x197   : > { %5062 = vst [vmem:[#allocation35_spill] sm:$0xff] %v4414_v14  ;;  %v4417_v54 = vadd.f32 %v2011_v24, %v4228_v22  ;;  %v358_v24 = vld [vmem:[%s4088_s30 + $0x298] sm:$0xff] }
 0x198   : > { %v2013_v17 = vpop.f32.mrf.mxu1  ;;  %v4419_v56 = vpop.f32.mrf.mxu0  ;;  %v3162_v39 = vcombine.high %v358_v24, %v362_v49  ;;  %v3161_v4 = vcombine.low %v358_v24, %v362_v49  ;;  %v374_v24 = vld [vmem:[%s4088_s30 + $0x318] sm:$0xff] }
 0x199   : > { %5063 = vst [vmem:[#allocation36_spill] sm:$0xff] %v4419_v56  ;;  %v4422_v33 = vadd.f32 %v2013_v17, %v4230_v25  ;;  %v3153_v17 = vcombine.low %v350_v12, %v354_v26  ;;  %v5064_v56 = vmov 0.0   ;;  %v370_v12 = vld [vmem:[%s4088_s30 + $0x2f8] sm:$0xff]  ;;  %v2677_v26 = vld [vmem:[#allocation7 + $0x90] sm:$0xff] }
 0x19a   : > { %v4425_v3 = vpop.f32.mrf.mxu1  ;;  %2515 = vmatmul.mubr.bf16.gmra.mxu1 %v3145_v48  ;;  %v4427_v14 = vpop.f32.mrf.mxu0  ;;  %2754 = vmatprep.subr.mxu0 %v5064_v56  ;;  %v3170_v0 = vcombine.high %v366_v42, %v370_v12 }
 0x19b   : > { %2524 = vmatprep.mubr.bf16.mxu1 %v3154_v21  ;;  %v2678_v21 = vld [vmem:[#allocation7 + $0x98] sm:$0xff] }
 0x19c   : > { %v4429_v6 = vpop.f32.mrf.mxu1  ;;  %v4431_v40 = vpop.f32.mrf.mxu0  ;;  %2755 = vmatpush2.msra.mxu0 %v2678_v21  ;;  %v2676_v21 = vld [vmem:[#allocation7 + $0x88] sm:$0xff] }
 0x19d   : > { %2756 = vmatprep.subr.mxu0 %v5064_v56 }
 0x19e   : > { %v4435_v2 = vpop.f32.mrf.mxu1  ;;  %v4440_v32 = vpop.f32.mrf.mxu0  ;;  %2757 = vmatpush2.msra.mxu0 %v2677_v26  ;;  %v378_v26 = vld [vmem:[%s4088_s30 + $0x338] sm:$0xff] }
 0x19f   : > { %2758 = vmatprep.subr.mxu0 %v5064_v56  ;;  %v3178_v61 = vcombine.high %v374_v24, %v378_v26 }
 0x1a0   : > { %v4438_v48 = vpop.f32.mrf.mxu1  ;;  %v4445_v18 = vpop.f32.mrf.mxu0  ;;  %2759 = vmatpush2.msra.mxu0 %v2676_v21 }
 0x1a1   : > { %5066 = vst [vmem:[#allocation38_spill] sm:$0xff] %v4445_v18  ;;  %2760 = vmatprep.subr.mxu0 %v5064_v56 }
 0x1a2   : > { %v4442_v23 = vpop.f32.mrf.mxu1  ;;  %2525 = vmatmul.mubr.bf16.gmra.mxu1 %v3153_v17  ;;  %v4454_v17 = vpop.f32.mrf.mxu0 }
 0x1a3   : > { %5065 = vst [vmem:[#allocation37_spill] sm:$0xff] %v4442_v23  ;;  %2534 = vmatprep.mubr.bf16.mxu1 %v3162_v39  ;;  %5069 = vst [vmem:[#allocation41_spill] sm:$0xff] %v4454_v17 }
 0x1a4   : > { %v4447_v15 = vpop.f32.mrf.mxu1 }
 0x1a5   : > { %5067 = vst [vmem:[#allocation39_spill] sm:$0xff] %v4447_v15  ;;  %v4461_v15 = vpop.f32.mrf.mxu0 }
 0x1a6   : > { %v4451_v9 = vpop.f32.mrf.mxu1  ;;  %5072 = vst [vmem:[#allocation44_spill] sm:$0xff] %v4461_v15 }
 0x1a7   : > { %5068 = vst [vmem:[#allocation40_spill] sm:$0xff] %v4451_v9  ;;  %v2675_v9 = vld [vmem:[#allocation7 + $0x80] sm:$0xff] }
 0x1a8   : > { %v4456_v39 = vpop.f32.mrf.mxu1  ;;  %2761 = vmatpush2.msra.mxu0 %v2675_v9  ;;  %v386_v9 = vld [vmem:[%s4088_s30 + $0x378] sm:$0xff] }
 0x1a9   : > { %5070 = vst [vmem:[#allocation42_spill] sm:$0xff] %v4456_v39  ;;  %v3169_v39 = vcombine.low %v366_v42, %v370_v12  ;;  %v3177_v42 = vcombine.low %v374_v24, %v378_v26 }
 0x1aa   : > { %v4458_v18 = vpop.f32.mrf.mxu1  ;;  %2535 = vmatmul.mubr.bf16.gmra.mxu1 %v3161_v4 }
 0x1ab   : > { %5071 = vst [vmem:[#allocation43_spill] sm:$0xff] %v4458_v18  ;;  %2544 = vmatprep.mubr.bf16.mxu1 %v3170_v0  ;;  %v4469_v18 = vpop.f32.mrf.mxu0 }
 0x1ac   : > { %v4463_v49 = vpop.f32.mrf.mxu1  ;;  %5075 = vst [vmem:[#allocation47_spill] sm:$0xff] %v4469_v18 }
 0x1ad   : > { %5073 = vst [vmem:[#allocation45_spill] sm:$0xff] %v4463_v49  ;;  %v4475_v56 = vpop.f32.mrf.mxu0  ;;  %v382_v49 = vld [vmem:[%s4088_s30 + $0x358] sm:$0xff] }
 0x1ae   : > { %v4467_v17 = vpop.f32.mrf.mxu1  ;;  %5078 = vst [vmem:[#allocation50_spill] sm:$0xff] %v4475_v56  ;;  %v3186_v12 = vcombine.high %v382_v49, %v386_v9  ;;  %v3185_v24 = vcombine.low %v382_v49, %v386_v9 }
 0x1af   : > { %5074 = vst [vmem:[#allocation46_spill] sm:$0xff] %v4467_v17  ;;  %v4483_v17 = vpop.f32.mrf.mxu0 }
 0x1b0   : > { %v4471_v4 = vpop.f32.mrf.mxu1  ;;  %5081 = vst [vmem:[#allocation53_spill] sm:$0xff] %v4483_v17 }
 0x1b1   : > { %5076 = vst [vmem:[#allocation48_spill] sm:$0xff] %v4471_v4 }
 0x1b2   : > { %v4473_v0 = vpop.f32.mrf.mxu1  ;;  %2545 = vmatmul.mubr.bf16.gmra.mxu1 %v3169_v39 }
 0x1b3   : > { %5077 = vst [vmem:[#allocation49_spill] sm:$0xff] %v4473_v0  ;;  %2554 = vmatprep.mubr.bf16.mxu1 %v3178_v61  ;;  %v4489_v61 = vpop.f32.mrf.mxu0  ;;  %v394_v0 = vld [vmem:[%s4088_s30 + $0x3b8] sm:$0xff] }
 0x1b4   : > { %v4477_v21 = vpop.f32.mrf.mxu1  ;;  %5084 = vst [vmem:[#allocation56_spill] sm:$0xff] %v4489_v61 }
 0x1b5   : > { %5079 = vst [vmem:[#allocation51_spill] sm:$0xff] %v4477_v21  ;;  %v390_v21 = vld [vmem:[%s4088_s30 + $0x398] sm:$0xff] }
 0x1b6   : > { %v4481_v15 = vpop.f32.mrf.mxu1  ;;  %v3194_v26 = vcombine.high %v390_v21, %v394_v0  ;;  %v3193_v23 = vcombine.low %v390_v21, %v394_v0 }
 0x1b7   : > { %5080 = vst [vmem:[#allocation52_spill] sm:$0xff] %v4481_v15  ;;  %v4497_v15 = vpop.f32.mrf.mxu0 }
 0x1b8   : > { %v4485_v18 = vpop.f32.mrf.mxu1  ;;  %5087 = vst [vmem:[#allocation59_spill] sm:$0xff] %v4497_v15 }
 0x1b9   : > { %5082 = vst [vmem:[#allocation54_spill] sm:$0xff] %v4485_v18 }
 0x1ba   : > { %v4487_v4 = vpop.f32.mrf.mxu1  ;;  %2555 = vmatmul.mubr.bf16.gmra.mxu1 %v3177_v42  ;;  %v4503_v42 = vpop.f32.mrf.mxu0 }
 0x1bb   : > { %5083 = vst [vmem:[#allocation55_spill] sm:$0xff] %v4487_v4  ;;  %2564 = vmatprep.mubr.bf16.mxu1 %v3186_v12  ;;  %v398_v4 = vld [vmem:[%s4088_s30 + $0x3d8] sm:$0xff] }
 0x1bc   : > { %v4491_v39 = vpop.f32.mrf.mxu1  ;;  %v4511_v49 = vpop.f32.mrf.mxu0 }
 0x1bd   : > { %5085 = vst [vmem:[#allocation57_spill] sm:$0xff] %v4491_v39  ;;  %v402_v39 = vld [vmem:[%s4088_s30 + $0x3f8] sm:$0xff]  ;;  %s3852_s30 = scalar_lea.vmem %s3851_s29, 8192 }
 0x1be   : > { %v4495_v56 = vpop.f32.mrf.mxu1  ;;  %p3854_p12 = scmp.lt.s32.totalorder %s3852_s30, %s3846_s22 }
 0x1bf   : > { %5086 = vst [vmem:[#allocation58_spill] sm:$0xff] %v4495_v56  ;;  %v3202_v56 = vcombine.high %v398_v4, %v402_v39 }
 0x1c0   : > { %v4499_v17 = vpop.f32.mrf.mxu1  ;;  %p3855_p7 = por %p3854_p12, %p3853_p6 }
 0x1c1   : > { %5088 = vst [vmem:[#allocation60_spill] sm:$0xff] %v4499_v17 }
 0x1c2   : > { %v4501_v18 = vpop.f32.mrf.mxu1  ;;  %2565 = vmatmul.mubr.bf16.gmra.mxu1 %v3185_v24  ;;  %v4517_v24 = vpop.f32.mrf.mxu0  ;;  %p3856_p9 = pnand %p3855_p7, %p3849_p2 }
 0x1c3   : > { %5089 = vst [vmem:[#allocation61_spill] sm:$0xff] %v4501_v18  ;;  %2574 = vmatprep.mubr.bf16.mxu1 %v3194_v26 }
 0x1c4   : > { %v4505_v12 = vpop.f32.mrf.mxu1  ;;  %v4523_v17 = vpop.f32.mrf.mxu0 }
 0x1c5   : > { %5090 = vst [vmem:[#allocation62_spill] sm:$0xff] %v4505_v12  ;;  %v3201_v12 = vcombine.low %v398_v4, %v402_v39 }
 0x1c6   : > { %v4509_v61 = vpop.f32.mrf.mxu1  ;;  %v4529_v21 = vpop.f32.mrf.mxu0 }
 0x1c7   : > { %5091 = vst [vmem:[#allocation63_spill] sm:$0xff] %v4509_v61 }
 0x1c8   : > { %v4513_v9 = vpop.f32.mrf.mxu1 }
 0x1c9   : > { %5092 = vst [vmem:[#allocation64_spill] sm:$0xff] %v4513_v9 }
 0x1ca   : > { %v4515_v15 = vpop.f32.mrf.mxu1  ;;  %2575 = vmatmul.mubr.bf16.gmra.mxu1 %v3193_v23 }
 0x1cb   : > { %5093 = vst [vmem:[#allocation65_spill] sm:$0xff] %v4515_v15  ;;  %2584 = vmatprep.mubr.bf16.mxu1 %v3202_v56  ;;  %v4535_v56 = vpop.f32.mrf.mxu0 }
 0x1cc   : > { %v4519_v26 = vpop.f32.mrf.mxu1  ;;  %5100 = vst [vmem:[#allocation72_spill] sm:$0xff] %v4535_v56 }
 0x1cd   : > { %5094 = vst [vmem:[#allocation66_spill] sm:$0xff] %v4519_v26  ;;  %v4542_v39 = vpop.f32.mrf.mxu0 }
 0x1ce   : > { %v4521_v18 = vpop.f32.mrf.mxu1 }
 0x1cf   : > { %5095 = vst [vmem:[#allocation67_spill] sm:$0xff] %v4521_v18 }
 0x1d0   : > { %v4525_v61 = vpop.f32.mrf.mxu1 }
 0x1d1   : > { %5096 = vst [vmem:[#allocation68_spill] sm:$0xff] %v4525_v61 }
 0x1d2   : > { %v4527_v0 = vpop.f32.mrf.mxu1  ;;  %2585 = vmatmul.mubr.bf16.gmra.mxu1 %v3201_v12 }
 0x1d3   : > { %5097 = vst [vmem:[#allocation69_spill] sm:$0xff] %v4527_v0 }
 0x1d4   : > { %v4531_v9 = vpop.f32.mrf.mxu1 }
 0x1d5   : > { %5098 = vst [vmem:[#allocation70_spill] sm:$0xff] %v4531_v9  ;;  %v4550_v9 = vpop.f32.mrf.mxu0 }
 0x1d6   : > { %v4533_v23 = vpop.f32.mrf.mxu1 }
 0x1d7   : > { %5099 = vst [vmem:[#allocation71_spill] sm:$0xff] %v4533_v23 }
 0x1d8   : > { %v4537_v15 = vpop.f32.mrf.mxu1 }
 0x1d9   : > { %5101 = vst [vmem:[#allocation73_spill] sm:$0xff] %v4537_v15 }
 0x1da   : > { %v2130_v26 = vpop.f32.mrf.mxu1 }
 0x1db   : > { %v4540_v4 = vadd.f32 %v2130_v26, %v4236_v28  ;;  %v4558_v26 = vpop.f32.mrf.mxu0 }
 0x1dc   : > { %v2132_v61 = vpop.f32.mrf.mxu1 }
 0x1dd   : > { %5102 = vst [vmem:[#allocation74_spill] sm:$0xff] %v4540_v4  ;;  %v4545_v0 = vadd.f32 %v2132_v61, %v4243_v34 }
 0x1de   : > { %v2134_v12 = vpop.f32.mrf.mxu1 }
 0x1df   : > { %v4548_v18 = vadd.f32 %v2134_v12, %v4249_v38  ;;  %v4566_v12 = vpop.f32.mrf.mxu0 }
 0x1e0   : > { %v2136_v23 = vpop.f32.mrf.mxu1 }
 0x1e1   : > { %5103 = vst [vmem:[#allocation75_spill] sm:$0xff] %v4548_v18  ;;  %v4553_v56 = vadd.f32 %v2136_v23, %v4254_v44 }
 0x1e2   : > { %v2140_v15 = vpop.f32.mrf.mxu1 }
 0x1e3   : > { %v4556_v28 = vadd.f32 %v2140_v15, %v4260_v47  ;;  %v4574_v15 = vpop.f32.mrf.mxu0 }
 0x1e4   : > { %v2142_v4 = vpop.f32.mrf.mxu1 }
 0x1e5   : > { %5104 = vst [vmem:[#allocation76_spill] sm:$0xff] %v4556_v28  ;;  %v4561_v34 = vadd.f32 %v2142_v4, %v4267_v53 }
 0x1e6   : > { %v2144_v61 = vpop.f32.mrf.mxu1 }
 0x1e7   : > { %v4564_v38 = vadd.f32 %v2144_v61, %v4273_v57  ;;  %v4582_v61 = vpop.f32.mrf.mxu0 }
 0x1e8   : > { %v2146_v18 = vpop.f32.mrf.mxu1 }
 0x1e9   : > { %5105 = vst [vmem:[#allocation77_spill] sm:$0xff] %v4564_v38  ;;  %v4569_v44 = vadd.f32 %v2146_v18, %v4278_v62 }
 0x1ea   : > { %v2150_v23 = vpop.f32.mrf.mxu1 }
 0x1eb   : > { %v4572_v47 = vadd.f32 %v2150_v23, %v4284_v1  ;;  %v4590_v23 = vpop.f32.mrf.mxu0 }
 0x1ec   : > { %v2152_v28 = vpop.f32.mrf.mxu1 }
 0x1ed   : > { %5106 = vst [vmem:[#allocation78_spill] sm:$0xff] %v4572_v47  ;;  %v4577_v53 = vadd.f32 %v2152_v28, %v4291_v7 }
 0x1ee   : > { %v2154_v4 = vpop.f32.mrf.mxu1 }
 0x1ef   : > { %v4580_v57 = vadd.f32 %v2154_v4, %v4297_v11  ;;  %v4598_v4 = vpop.f32.mrf.mxu0 }
 0x1f0   : > { %v2156_v38 = vpop.f32.mrf.mxu1 }
 0x1f1   : > { %5107 = vst [vmem:[#allocation79_spill] sm:$0xff] %v4580_v57  ;;  %v4585_v62 = vadd.f32 %v2156_v38, %v4302_v16 }
 0x1f2   : > { %v2160_v18 = vpop.f32.mrf.mxu1 }
 0x1f3   : > { %v4588_v1 = vadd.f32 %v2160_v18, %v4308_v19  ;;  %v4606_v18 = vpop.f32.mrf.mxu0 }
 0x1f4   : > { %v2162_v47 = vpop.f32.mrf.mxu1 }
 0x1f5   : > { %5108 = vst [vmem:[#allocation80_spill] sm:$0xff] %v4588_v1  ;;  %v4593_v7 = vadd.f32 %v2162_v47, %v4315_v29 }
 0x1f6   : > { %v2164_v28 = vpop.f32.mrf.mxu1 }
 0x1f7   : > { %v4596_v11 = vadd.f32 %v2164_v28, %v4321_v35  ;;  %v4614_v28 = vpop.f32.mrf.mxu0 }
 0x1f8   : > { %v2166_v57 = vpop.f32.mrf.mxu1 }
 0x1f9   : > { %5109 = vst [vmem:[#allocation81_spill] sm:$0xff] %v4596_v11  ;;  %v4601_v16 = vadd.f32 %v2166_v57, %v4326_v45 }
 0x1fa   : > { %v2170_v38 = vpop.f32.mrf.mxu1 }
 0x1fb   : > { %v4604_v19 = vadd.f32 %v2170_v38, %v4332_v51  ;;  %v4622_v38 = vpop.f32.mrf.mxu0 }
 0x1fc   : > { %v2172_v1 = vpop.f32.mrf.mxu1 }
 0x1fd   : > { %5110 = vst [vmem:[#allocation82_spill] sm:$0xff] %v4604_v19  ;;  %v4609_v29 = vadd.f32 %v2172_v1, %v4339_v60 }
 0x1fe   : > { %v2174_v47 = vpop.f32.mrf.mxu1 }
 0x1ff   : > { %v4612_v35 = vadd.f32 %v2174_v47, %v4345_v5  ;;  %v4630_v47 = vpop.f32.mrf.mxu0 }
 0x200   : > { %v2176_v11 = vpop.f32.mrf.mxu1 }
 0x201   : > { %5111 = vst [vmem:[#allocation83_spill] sm:$0xff] %v4612_v35  ;;  %v4617_v45 = vadd.f32 %v2176_v11, %v4350_v13 }
 0x202   : > { %v2180_v57 = vpop.f32.mrf.mxu1 }
 0x203   : > { %v4620_v51 = vadd.f32 %v2180_v57, %v4356_v20  ;;  %v4638_v57 = vpop.f32.mrf.mxu0 }
 0x204   : > { %v2182_v19 = vpop.f32.mrf.mxu1 }
 0x205   : > { %5112 = vst [vmem:[#allocation84_spill] sm:$0xff] %v4620_v51  ;;  %v4625_v60 = vadd.f32 %v2182_v19, %v4363_v37 }
 0x206   : > { %v2184_v1 = vpop.f32.mrf.mxu1 }
 0x207   : > { %v4628_v5 = vadd.f32 %v2184_v1, %v4369_v52  ;;  %v4646_v1 = vpop.f32.mrf.mxu0 }
 0x208   : > { %v2186_v35 = vpop.f32.mrf.mxu1 }
 0x209   : > { %5113 = vst [vmem:[#allocation85_spill] sm:$0xff] %v4628_v5  ;;  %v4633_v13 = vadd.f32 %v2186_v35, %v4374_v8 }
 0x20a   : > { %v2190_v11 = vpop.f32.mrf.mxu1 }
 0x20b   : > { %v4636_v20 = vadd.f32 %v2190_v11, %v4380_v58  ;;  %v1858_v58 = vadd.f32 %v4233_v27, %v4228_v22  ;;  %v1860_v11 = vadd.f32 %v4238_v31, %v4230_v25  ;;  %v1864_v27 = vadd.f32 %v4251_v43, %v4230_v25 }
 0x20c   : > { %v2192_v51 = vpop.f32.mrf.mxu1  ;;  %v1870_v43 = vadd.f32 %v4262_v50, %v4230_v25 }
 0x20d   : > { %5114 = vst [vmem:[#allocation86_spill] sm:$0xff] %v4636_v20  ;;  %v4641_v37 = vadd.f32 %v2192_v51, %v4387_v63  ;;  %v4658_v51 = vpop.f32.mrf.mxu0  ;;  %v2053_v31 = vadd.f32 %v4429_v6, %v1860_v11  ;;  %v2057_v6 = vadd.f32 %v4438_v48, %v1864_v27 }
 0x20e   : > { %v2194_v19 = vpop.f32.mrf.mxu1 }
 0x20f   : > { %5115 = vst [vmem:[#allocation87_spill] sm:$0xff] %v4641_v37  ;;  %v4644_v52 = vadd.f32 %v2194_v19, %v4393_v10 }
 0x210   : > { %v2196_v5 = vpop.f32.mrf.mxu1 }
 0x211   : > { %5116 = vst [vmem:[#allocation88_spill] sm:$0xff] %v4644_v52  ;;  %v4649_v8 = vadd.f32 %v2196_v5, %v4398_v59  ;;  %v1862_v59 = vadd.f32 %v4246_v36, %v4228_v22  ;;  %v2051_v5 = vadd.f32 %v4425_v3, %v1858_v58  ;;  %v1868_v36 = vadd.f32 %v4257_v46, %v4228_v22 }
 0x212   : > { %v2200_v35 = vpop.f32.mrf.mxu1  ;;  %v1872_v46 = vadd.f32 %v4270_v55, %v4228_v22  ;;  %v5126_v55 = vld [vmem:[#allocation13_spill] sm:$0xff] }
 0x213   : > { %5117 = vst [vmem:[#allocation89_spill] sm:$0xff] %v4649_v8  ;;  %v4656_v63 = vadd.f32 %v2200_v35, %v4404_v30  ;;  %v4672_v35 = vpop.f32.mrf.mxu0  ;;  %v2244_v3 = vadd.f32 %v4427_v14, %v2051_v5  ;;  %v2055_v58 = vadd.f32 %v4435_v2, %v1862_v59  ;;  %v5122_v5 = vld [vmem:[#allocation37_spill] sm:$0xff] }
 0x214   : > { %v2202_v10 = vpop.f32.mrf.mxu1  ;;  %v2061_v2 = vadd.f32 %v5122_v5, %v1868_v36 }
 0x215   : > { %5118 = vst [vmem:[#allocation90_spill] sm:$0xff] %v4656_v63  ;;  %v4661_v19 = vadd.f32 %v2202_v10, %v4411_v41  ;;  %v2248_v14 = vadd.f32 %v4440_v32, %v2055_v58  ;;  %v1878_v32 = vadd.f32 %v5126_v55, %v4228_v22  ;;  %v5127_v58 = vld [vmem:[#allocation41_spill] sm:$0xff]  ;;  %v5133_v55 = vld [vmem:[#allocation47_spill] sm:$0xff] }
 0x216   : > { %v2204_v8 = vpop.f32.mrf.mxu1  ;;  %v2254_v36 = vadd.f32 %v5127_v58, %v2061_v2  ;;  %v5134_v58 = vld [vmem:[#allocation43_spill] sm:$0xff] }
 0x217   : > { %5119 = vst [vmem:[#allocation91_spill] sm:$0xff] %v4661_v19  ;;  %v4670_v30 = vadd.f32 %v2204_v8, %v4417_v54  ;;  %v2246_v54 = vadd.f32 %v4431_v40, %v2053_v31  ;;  %v4685_v8 = vpop.f32.mrf.mxu0  ;;  %v5125_v31 = vld [vmem:[#allocation39_spill] sm:$0xff] }
 0x218   : > { %v2206_v63 = vpop.f32.mrf.mxu1  ;;  %v2063_v48 = vadd.f32 %v5125_v31, %v1870_v43 }
 0x219   : > { %5120 = vst [vmem:[#allocation92_spill] sm:$0xff] %v4670_v30  ;;  %v4675_v41 = vadd.f32 %v2206_v63, %v4422_v33  ;;  %v5124_v30 = vld [vmem:[#allocation38_spill] sm:$0xff]  ;;  %v4695_v27 = vpop.f32.mrf.mxu0 }
 0x21a   : > { %v2436_v10 = vpop.f32.mrf.mxu1  ;;  %v2250_v40 = vadd.f32 %v5124_v30, %v2057_v6  ;;  %v5130_v6 = vld [vmem:[#allocation44_spill] sm:$0xff] }
 0x21b   : > { %5121 = vst [vmem:[#allocation93_spill] sm:$0xff] %v4675_v41  ;;  %v2437_v11 = vadd.f32 %v2436_v10, %v2244_v3  ;;  %v5123_v41 = vld [vmem:[#allocation12_spill] sm:$0xff]  ;;  %v2256_v43 = vadd.f32 %v5130_v6, %v2063_v48  ;;  %v5136_v6 = vld [vmem:[#allocation50_spill] sm:$0xff] }
 0x21c   : > { %v2438_v33 = vpop.f32.mrf.mxu1  ;;  %v1874_v50 = vadd.f32 %v5123_v41, %v4230_v25  ;;  %v5129_v41 = vld [vmem:[#allocation14_spill] sm:$0xff] }
 0x21d   : > { %v2439_v63 = vadd.f32 %v2438_v33, %v2246_v54  ;;  %v5128_v33 = vld [vmem:[#allocation40_spill] sm:$0xff]  ;;  %v1880_v30 = vadd.f32 %v5129_v41, %v4230_v25 }
 0x21e   : > { %v2440_v59 = vpop.f32.mrf.mxu1  ;;  %v2065_v5 = vadd.f32 %v5128_v33, %v1872_v46  ;;  %v2071_v33 = vadd.f32 %v5134_v58, %v1878_v32  ;;  %v5135_v41 = vld [vmem:[#allocation16_spill] sm:$0xff] }
 0x21f   : > { %3638 = vtanh.f32 %v2439_v63  ;;  %v2441_v3 = vadd.f32 %v2440_v59, %v2248_v14  ;;  %v5131_v63 = vld [vmem:[#allocation42_spill] sm:$0xff]  ;;  %v1884_v48 = vadd.f32 %v5135_v41, %v4230_v25 }
 0x220   : > { %3640 = vtanh.f32 %v2437_v11  ;;  %v2442_v10 = vpop.f32.mrf.mxu1  ;;  %v2067_v31 = vadd.f32 %v5131_v63, %v1874_v50  ;;  %v4705_v11 = vpop.f32.mrf.mxu0  ;;  %v2258_v46 = vadd.f32 %v5133_v55, %v2065_v5  ;;  %v5140_v55 = vld [vmem:[#allocation46_spill] sm:$0xff] }
 0x221   : > { %v2443_v54 = vadd.f32 %v2442_v10, %v2250_v40  ;;  %v5132_v10 = vld [vmem:[#allocation15_spill] sm:$0xff]  ;;  %v5141_v41 = vld [vmem:[#allocation18_spill] sm:$0xff] }
 0x222   : > { %v2446_v19 = vpop.f32.mrf.mxu1  ;;  %v1882_v2 = vadd.f32 %v5132_v10, %v4228_v22  ;;  %v2260_v50 = vadd.f32 %v5136_v6, %v2067_v31  ;;  %v5139_v10 = vld [vmem:[#allocation53_spill] sm:$0xff]  ;;  %v1890_v31 = vadd.f32 %v5141_v41, %v4230_v25  ;;  %v5142_v6 = vld [vmem:[#allocation56_spill] sm:$0xff] }
 0x223   : > { %3642 = vtanh.f32 %v2443_v54  ;;  %v2447_v14 = vadd.f32 %v2446_v19, %v2254_v36  ;;  %v5137_v54 = vld [vmem:[#allocation45_spill] sm:$0xff]  ;;  %v2264_v32 = vadd.f32 %v5139_v10, %v2071_v33  ;;  %v5145_v10 = vld [vmem:[#allocation59_spill] sm:$0xff] }
 0x224   : > { %3644 = vtanh.f32 %v2441_v3  ;;  %v2448_v59 = vpop.f32.mrf.mxu1  ;;  %v2073_v63 = vadd.f32 %v5137_v54, %v1880_v30  ;;  %v4715_v3 = vpop.f32.mrf.mxu0  ;;  %v2075_v58 = vadd.f32 %v5140_v55, %v1882_v2  ;;  %v5144_v2 = vld [vmem:[#allocation19_spill] sm:$0xff]  ;;  %v5146_v41 = vld [vmem:[#allocation49_spill] sm:$0xff] }
 0x225   : > { %v2449_v40 = vadd.f32 %v2448_v59, %v2256_v43  ;;  %v5138_v59 = vld [vmem:[#allocation17_spill] sm:$0xff]  ;;  %v1892_v33 = vadd.f32 %v5144_v2, %v4228_v22 }
 0x226   : > { %v2450_v52 = vpop.f32.mrf.mxu1  ;;  %v1888_v5 = vadd.f32 %v5138_v59, %v4228_v22  ;;  %v2266_v30 = vadd.f32 %v5142_v6, %v2073_v63  ;;  %v2268_v55 = vadd.f32 %v5145_v10, %v2075_v58  ;;  %v5150_v10 = vld [vmem:[#allocation52_spill] sm:$0xff] }
 0x227   : > { %3646 = vtanh.f32 %v2449_v40  ;;  %v2451_v19 = vadd.f32 %v2450_v52, %v2258_v46  ;;  %v5143_v40 = vld [vmem:[#allocation48_spill] sm:$0xff]  ;;  %v4725_v52 = vpop.f32.mrf.mxu0 }
 0x228   : > { %3648 = vtanh.f32 %v2447_v14  ;;  %v2452_v36 = vpop.f32.mrf.mxu1  ;;  %v2077_v54 = vadd.f32 %v5143_v40, %v1884_v48  ;;  %v2081_v20 = vadd.f32 %v5146_v41, %v1888_v5  ;;  %v5147_v48 = vld [vmem:[#allocation20_spill] sm:$0xff]  ;;  %v5149_v5 = vld [vmem:[#allocation21_spill] sm:$0xff]  ;;  %v2085_v41 = vadd.f32 %v5150_v10, %v1892_v33 }
 0x229   : > { %v2453_v43 = vadd.f32 %v2452_v36, %v2260_v50 }
 0x22a   : > { %v2456_v37 = vpop.f32.mrf.mxu1  ;;  %v2270_v6 = vadd.f32 %v4503_v42, %v2077_v54  ;;  %v2274_v2 = vadd.f32 %v4511_v49, %v2081_v20  ;;  %v5153_v20 = vld [vmem:[#allocation23_spill] sm:$0xff] }
 0x22b   : > { %3650 = vtanh.f32 %v2453_v43  ;;  %v2457_v46 = vadd.f32 %v2456_v37, %v2264_v32  ;;  %v1894_v43 = vadd.f32 %v5147_v48, %v4230_v25  ;;  %v1902_v33 = vadd.f32 %v5153_v20, %v4228_v22 }
 0x22c   : > { %v3639_v14 = vpop.eup %3638  ;;  %3652 = vtanh.f32 %v2451_v19  ;;  %v2458_v50 = vpop.f32.mrf.mxu1  ;;  %v5148_v19 = vld [vmem:[#allocation51_spill] sm:$0xff] }
 0x22d   : > { %v3641_v36 = vpop.eup %3640  ;;  %v2459_v59 = vadd.f32 %v2458_v50, %v2266_v30  ;;  %2762 = vmatprep.mubr.f32.mxu0 %v3639_v14  ;;  %v2083_v37 = vadd.f32 %v5148_v19, %v1890_v31  ;;  %v4735_v30 = vpop.f32.mrf.mxu0  ;;  %v5151_v31 = vld [vmem:[#allocation22_spill] sm:$0xff] }
 0x22e   : > { %v2460_v63 = vpop.f32.mrf.mxu1  ;;  %2763 = vmatmul.mubr.f32.vlgmr.msra.gmra.mxu0 %v3641_v36  ;;  %v1898_v36 = vadd.f32 %v5149_v5, %v4228_v22  ;;  %v1900_v54 = vadd.f32 %v5151_v31, %v4230_v25 }
 0x22f   : > { %3654 = vtanh.f32 %v2459_v59  ;;  %v2461_v40 = vadd.f32 %v2460_v63, %v2268_v55  ;;  %v2276_v59 = vadd.f32 %v4517_v24, %v2083_v37  ;;  %v4745_v48 = vpop.f32.mrf.mxu0 }
 0x230   : > { %v3643_v32 = vpop.eup %3642  ;;  %3656 = vtanh.f32 %v2457_v46  ;;  %v2462_v14 = vpop.f32.mrf.mxu1  ;;  %v5152_v46 = vld [vmem:[#allocation54_spill] sm:$0xff] }
 0x231   : > { %v3645_v50 = vpop.eup %3644  ;;  %v2463_v58 = vadd.f32 %v2462_v14, %v2270_v6  ;;  %2767 = vmatprep.mubr.f32.mxu0 %v3643_v32  ;;  %v2087_v55 = vadd.f32 %v5152_v46, %v1894_v43  ;;  %v2278_v14 = vadd.f32 %v4523_v17, %v2085_v41  ;;  %v5155_v43 = vld [vmem:[#allocation24_spill] sm:$0xff] }
 0x232   : > { %v2466_v42 = vpop.f32.mrf.mxu1  ;;  %2768 = vmatmul.mubr.f32.gmra.mxu0 %v3645_v50  ;;  %v5154_v50 = vld [vmem:[#allocation55_spill] sm:$0xff]  ;;  %v1904_v37 = vadd.f32 %v5155_v43, %v4230_v25 }
 0x233   : > { %3658 = vtanh.f32 %v2463_v58  ;;  %v2467_v6 = vadd.f32 %v2466_v42, %v2274_v2  ;;  %v2091_v5 = vadd.f32 %v5154_v50, %v1898_v36  ;;  %v2280_v58 = vadd.f32 %v4529_v21, %v2087_v55  ;;  %v4755_v42 = vpop.f32.mrf.mxu0  ;;  %v5157_v36 = vld [vmem:[#allocation25_spill] sm:$0xff] }
 0x234   : > { %v3647_v63 = vpop.eup %3646  ;;  %3660 = vtanh.f32 %v2461_v40  ;;  %v2468_v19 = vpop.f32.mrf.mxu1  ;;  %v5156_v40 = vld [vmem:[#allocation57_spill] sm:$0xff]  ;;  %v1908_v41 = vadd.f32 %v5157_v36, %v4228_v22 }
 0x235   : > { %v3649_v32 = vpop.eup %3648  ;;  %v2469_v49 = vadd.f32 %v2468_v19, %v2276_v59  ;;  %2772 = vmatprep.mubr.f32.mxu0 %v3647_v63  ;;  %v2093_v2 = vadd.f32 %v5156_v40, %v1900_v54  ;;  %v5158_v63 = vld [vmem:[#allocation72_spill] sm:$0xff]  ;;  %v5160_v54 = vld [vmem:[#allocation26_spill] sm:$0xff] }
 0x236   : > { %v2470_v24 = vpop.f32.mrf.mxu1  ;;  %2773 = vmatmul.mubr.f32.gmra.mxu0 %v3649_v32  ;;  %v2284_v19 = vadd.f32 %v5158_v63, %v2091_v5  ;;  %v5159_v32 = vld [vmem:[#allocation58_spill] sm:$0xff]  ;;  %v1910_v55 = vadd.f32 %v5160_v54, %v4230_v25 }
 0x237   : > { %3662 = vtanh.f32 %v2469_v49  ;;  %v2471_v31 = vadd.f32 %v2470_v24, %v2278_v14  ;;  %v2095_v20 = vadd.f32 %v5159_v32, %v1902_v33  ;;  %v2286_v49 = vadd.f32 %v4542_v39, %v2093_v2  ;;  %v4765_v24 = vpop.f32.mrf.mxu0  ;;  %v5162_v33 = vld [vmem:[#allocation27_spill] sm:$0xff] }
 0x238   : > { %v3651_v10 = vpop.eup %3650  ;;  %3664 = vtanh.f32 %v2467_v6  ;;  %v2472_v59 = vpop.f32.mrf.mxu1  ;;  %v5161_v6 = vld [vmem:[#allocation60_spill] sm:$0xff] }
 0x239   : > { %v3653_v46 = vpop.eup %3652  ;;  %v2473_v17 = vadd.f32 %v2472_v59, %v2280_v58  ;;  %2777 = vmatprep.mubr.f32.mxu0 %v3651_v10  ;;  %v2097_v14 = vadd.f32 %v5161_v6, %v1904_v37  ;;  %v1912_v10 = vadd.f32 %v5162_v33, %v4228_v22  ;;  %v2288_v59 = vadd.f32 %v4550_v9, %v2095_v20  ;;  %v5164_v37 = vld [vmem:[#allocation28_spill] sm:$0xff]  ;;  %v4775_v32 = vpop.f32.mrf.mxu0 }
 0x23a   : > { %v2476_v21 = vpop.f32.mrf.mxu1  ;;  %2778 = vmatmul.mubr.f32.gmra.mxu0 %v3653_v46  ;;  %v5163_v46 = vld [vmem:[#allocation61_spill] sm:$0xff]  ;;  %v1914_v2 = vadd.f32 %v5164_v37, %v4230_v25 }
 0x23b   : > { %3666 = vtanh.f32 %v2473_v17  ;;  %v2477_v43 = vadd.f32 %v2476_v21, %v2284_v19  ;;  %v2101_v36 = vadd.f32 %v5163_v46, %v1908_v41  ;;  %v2290_v17 = vadd.f32 %v4558_v26, %v2097_v14  ;;  %v5166_v41 = vld [vmem:[#allocation29_spill] sm:$0xff] }
 0x23c   : > { %v3655_v50 = vpop.eup %3654  ;;  %3668 = vtanh.f32 %v2471_v31  ;;  %v2478_v58 = vpop.f32.mrf.mxu1  ;;  %v5165_v31 = vld [vmem:[#allocation62_spill] sm:$0xff]  ;;  %v1918_v20 = vadd.f32 %v5166_v41, %v4228_v22 }
 0x23d   : > { %v3657_v40 = vpop.eup %3656  ;;  %v2479_v5 = vadd.f32 %v2478_v58, %v2286_v49  ;;  %2782 = vmatprep.mubr.f32.mxu0 %v3655_v50  ;;  %v2103_v63 = vadd.f32 %v5165_v31, %v1910_v55  ;;  %v2294_v6 = vadd.f32 %v4566_v12, %v2101_v36  ;;  %v5167_v50 = vld [vmem:[#allocation63_spill] sm:$0xff]  ;;  %v5168_v55 = vld [vmem:[#allocation30_spill] sm:$0xff]  ;;  %v5171_v31 = vld [vmem:[#allocation65_spill] sm:$0xff] }
 0x23e   : > { %v2480_v39 = vpop.f32.mrf.mxu1  ;;  %2783 = vmatmul.mubr.f32.gmra.mxu0 %v3657_v40  ;;  %v2105_v58 = vadd.f32 %v5167_v50, %v1912_v10  ;;  %v1920_v14 = vadd.f32 %v5168_v55, %v4230_v25  ;;  %v5170_v10 = vld [vmem:[#allocation31_spill] sm:$0xff] }
 0x23f   : > { %3670 = vtanh.f32 %v2479_v5  ;;  %v2481_v21 = vadd.f32 %v2480_v39, %v2288_v59  ;;  %v2296_v40 = vadd.f32 %v4574_v15, %v2103_v63  ;;  %v4785_v59 = vpop.f32.mrf.mxu0  ;;  %v1922_v36 = vadd.f32 %v5170_v10, %v4228_v22 }
 0x240   : > { %v3659_v19 = vpop.eup %3658  ;;  %3672 = vtanh.f32 %v2477_v43  ;;  %v2482_v54 = vpop.f32.mrf.mxu1  ;;  %v5169_v43 = vld [vmem:[#allocation64_spill] sm:$0xff] }
 0x241   : > { %v3661_v49 = vpop.eup %3660  ;;  %v2483_v9 = vadd.f32 %v2482_v54, %v2290_v17  ;;  %2787 = vmatprep.mubr.f32.mxu0 %v3659_v19  ;;  %v2107_v5 = vadd.f32 %v5169_v43, %v1914_v2  ;;  %v2298_v17 = vadd.f32 %v4582_v61, %v2105_v58  ;;  %v2111_v19 = vadd.f32 %v5171_v31, %v1918_v20  ;;  %v5172_v2 = vld [vmem:[#allocation32_spill] sm:$0xff]  ;;  %v4795_v41 = vpop.f32.mrf.mxu0  ;;  %v5174_v20 = vld [vmem:[#allocation33_spill] sm:$0xff] }
 0x242   : > { %v2486_v26 = vpop.f32.mrf.mxu1  ;;  %2788 = vmatmul.mubr.f32.gmra.mxu0 %v3661_v49  ;;  %v1924_v63 = vadd.f32 %v5172_v2, %v4230_v25  ;;  %v1928_v58 = vadd.f32 %v5174_v20, %v4228_v22  ;;  %v5179_v2 = vld [vmem:[#allocation69_spill] sm:$0xff] }
 0x243   : > { %3674 = vtanh.f32 %v2483_v9  ;;  %v2487_v46 = vadd.f32 %v2486_v26, %v2294_v6  ;;  %v2300_v54 = vadd.f32 %v4590_v23, %v2107_v5  ;;  %v2304_v55 = vadd.f32 %v4598_v4, %v2111_v19 }
 0x244   : > { %v3663_v33 = vpop.eup %3662  ;;  %3676 = vtanh.f32 %v2481_v21  ;;  %v2488_v39 = vpop.f32.mrf.mxu1  ;;  %v5173_v21 = vld [vmem:[#allocation66_spill] sm:$0xff] }
 0x245   : > { %v3665_v37 = vpop.eup %3664  ;;  %v2489_v12 = vadd.f32 %v2488_v39, %v2296_v40  ;;  %2792 = vmatprep.mubr.f32.mxu0 %v3663_v33  ;;  %v2113_v49 = vadd.f32 %v5173_v21, %v1920_v14  ;;  %v5175_v40 = vld [vmem:[#allocation67_spill] sm:$0xff]  ;;  %v5176_v14 = vld [vmem:[#allocation34_spill] sm:$0xff] }
 0x246   : > { %v2490_v15 = vpop.f32.mrf.mxu1  ;;  %2793 = vmatmul.mubr.f32.gmra.mxu0 %v3665_v37  ;;  %v2115_v43 = vadd.f32 %v5175_v40, %v1922_v36  ;;  %v1930_v5 = vadd.f32 %v5176_v14, %v4230_v25  ;;  %v5178_v36 = vld [vmem:[#allocation35_spill] sm:$0xff] }
 0x247   : > { %3678 = vtanh.f32 %v2489_v12  ;;  %v2491_v6 = vadd.f32 %v2490_v15, %v2298_v17  ;;  %v2306_v33 = vadd.f32 %v4606_v18, %v2113_v49  ;;  %v4805_v12 = vpop.f32.mrf.mxu0  ;;  %v1932_v19 = vadd.f32 %v5178_v36, %v4228_v22 }
 0x248   : > { %v3667_v9 = vpop.eup %3666  ;;  %3680 = vtanh.f32 %v2487_v46  ;;  %v2492_v50 = vpop.f32.mrf.mxu1  ;;  %v5177_v46 = vld [vmem:[#allocation68_spill] sm:$0xff]  ;;  %v2308_v15 = vadd.f32 %v4614_v28, %v2115_v43 }
 0x249   : > { %v3669_v26 = vpop.eup %3668  ;;  %v2493_v61 = vadd.f32 %v2492_v50, %v2300_v54  ;;  %2797 = vmatprep.mubr.f32.mxu0 %v3667_v9  ;;  %v2117_v39 = vadd.f32 %v5177_v46, %v1924_v63  ;;  %v2121_v54 = vadd.f32 %v5179_v2, %v1928_v58  ;;  %v5180_v63 = vld [vmem:[#allocation36_spill] sm:$0xff]  ;;  %v5181_v9 = vld [vmem:[#allocation70_spill] sm:$0xff] }
 0x24a   : > { %v2496_v23 = vpop.f32.mrf.mxu1  ;;  %2798 = vmatmul.mubr.f32.gmra.mxu0 %v3669_v26  ;;  %v1934_v21 = vadd.f32 %v5180_v63, %v4230_v25  ;;  %v4815_v26 = vpop.f32.mrf.mxu0  ;;  %v5184_v2 = vld [vmem:[#allocation74_spill] sm:$0xff] }
 0x24b   : > { %3682 = vtanh.f32 %v2493_v61  ;;  %v2497_v10 = vadd.f32 %v2496_v23, %v2304_v55  ;;  %v2310_v49 = vadd.f32 %v4622_v38, %v2117_v39  ;;  %v2314_v58 = vadd.f32 %v4630_v47, %v2121_v54  ;;  %v5182_v55 = vld [vmem:[#allocation71_spill] sm:$0xff]  ;;  %v5183_v38 = vld [vmem:[#allocation73_spill] sm:$0xff] }
 0x24c   : > { %v3671_v37 = vpop.eup %3670  ;;  %3684 = vtanh.f32 %v2491_v6  ;;  %v2498_v17 = vpop.f32.mrf.mxu1  ;;  %v2123_v6 = vadd.f32 %v5181_v9, %v1930_v5  ;;  %v2125_v40 = vadd.f32 %v5182_v55, %v1932_v19  ;;  %v2127_v23 = vadd.f32 %v5183_v38, %v1934_v21 }
 0x24d   : > { %v3673_v31 = vpop.eup %3672  ;;  %v2499_v4 = vadd.f32 %v2498_v17, %v2306_v33  ;;  %2802 = vmatprep.mubr.f32.mxu0 %v3671_v37  ;;  %v4821_v5 = vpop.f32.mrf.mxu0  ;;  %v2324_v54 = vadd.f32 %v4672_v35, %v5184_v2  ;;  %v2330_v35 = vadd.f32 %v4705_v11, %v4553_v56 }
 0x24e   : > { %v2500_v18 = vpop.f32.mrf.mxu1  ;;  %2803 = vmatmul.mubr.f32.gmra.mxu0 %v3673_v31  ;;  %v2316_v25 = vadd.f32 %v4638_v57, %v2123_v6  ;;  %v2318_v47 = vadd.f32 %v4646_v1, %v2125_v40  ;;  %v2320_v17 = vadd.f32 %v4658_v51, %v2127_v23  ;;  %v2326_v1 = vadd.f32 %v4685_v8, %v4545_v0  ;;  %v5186_v40 = vld [vmem:[#allocation76_spill] sm:$0xff] }
 0x24f   : > { %3686 = vtanh.f32 %v2499_v4  ;;  %v2501_v61 = vadd.f32 %v2500_v18, %v2308_v15  ;;  %v4825_v31 = vpop.f32.mrf.mxu0 }
 0x250   : > { %v3675_v50 = vpop.eup %3674  ;;  %3688 = vtanh.f32 %v2497_v10  ;;  %v2502_v22 = vpop.f32.mrf.mxu1 }
 0x251   : > { %v3677_v20 = vpop.eup %3676  ;;  %v2503_v28 = vadd.f32 %v2502_v22, %v2310_v49  ;;  %2807 = vmatprep.mubr.f32.mxu0 %v3675_v50  ;;  %v4831_v63 = vpop.f32.mrf.mxu0  ;;  %v5185_v50 = vld [vmem:[#allocation75_spill] sm:$0xff] }
 0x252   : > { %v2506_v43 = vpop.f32.mrf.mxu1  ;;  %2808 = vmatmul.mubr.f32.gmra.mxu0 %v3677_v20 }
 0x253   : > { %3690 = vtanh.f32 %v2503_v28  ;;  %v2507_v33 = vadd.f32 %v2506_v43, %v2314_v58  ;;  %v4837_v8 = vpop.f32.mrf.mxu0  ;;  %v2334_v43 = vadd.f32 %v4715_v3, %v5186_v40  ;;  %v2340_v3 = vadd.f32 %v4745_v48, %v4569_v44 }
 0x254   : > { %v3679_v14 = vpop.eup %3678  ;;  %3692 = vtanh.f32 %v2501_v61  ;;  %v2508_v46 = vpop.f32.mrf.mxu1  ;;  %v2328_v61 = vadd.f32 %v4695_v27, %v5185_v50  ;;  %v2336_v27 = vadd.f32 %v4725_v52, %v4561_v34 }
 0x255   : > { %v3681_v39 = vpop.eup %3680  ;;  %v2509_v37 = vadd.f32 %v2508_v46, %v2316_v25  ;;  %2812 = vmatprep.mubr.f32.mxu0 %v3679_v14  ;;  %v4843_v11 = vpop.f32.mrf.mxu0  ;;  %v5187_v46 = vld [vmem:[#allocation77_spill] sm:$0xff] }
 0x256   : > { %v2510_v10 = vpop.f32.mrf.mxu1  ;;  %2813 = vmatmul.mubr.f32.gmra.mxu0 %v3681_v39  ;;  %v2338_v39 = vadd.f32 %v4735_v30, %v5187_v46  ;;  %v2346_v30 = vadd.f32 %v4765_v24, %v4577_v53 }
 0x257   : > { %3694 = vtanh.f32 %v2509_v37  ;;  %v2511_v4 = vadd.f32 %v2510_v10, %v2318_v47  ;;  %v4849_v52 = vpop.f32.mrf.mxu0 }
 0x258   : > { %v3683_v57 = vpop.eup %3682  ;;  %3696 = vtanh.f32 %v2507_v33  ;;  %v2512_v36 = vpop.f32.mrf.mxu1 }
 0x259   : > { %v3685_v19 = vpop.eup %3684  ;;  %v2513_v15 = vadd.f32 %v2512_v36, %v2320_v17  ;;  %2817 = vmatprep.mubr.f32.mxu0 %v3683_v57  ;;  %v4855_v48 = vpop.f32.mrf.mxu0 }
 0x25a   : > { %v2516_v18 = vpop.f32.mrf.mxu1  ;;  %2818 = vmatmul.mubr.f32.gmra.mxu0 %v3685_v19 }
 0x25b   : > { %3698 = vtanh.f32 %v2513_v15  ;;  %v2517_v21 = vadd.f32 %v2516_v18, %v2324_v54  ;;  %v4861_v24 = vpop.f32.mrf.mxu0 }
 0x25c   : > { %v3687_v51 = vpop.eup %3686  ;;  %3700 = vtanh.f32 %v2511_v4  ;;  %v2518_v49 = vpop.f32.mrf.mxu1  ;;  %v5188_v4 = vld [vmem:[#allocation78_spill] sm:$0xff] }
 0x25d   : > { %v3689_v9 = vpop.eup %3688  ;;  %v2519_v6 = vadd.f32 %v2518_v49, %v2326_v1  ;;  %2822 = vmatprep.mubr.f32.mxu0 %v3687_v51  ;;  %v2344_v36 = vadd.f32 %v4755_v42, %v5188_v4  ;;  %v5189_v1 = vld [vmem:[#allocation79_spill] sm:$0xff]  ;;  %v2350_v42 = vadd.f32 %v4785_v59, %v4585_v62  ;;  %v2379_v59 = vpop.f32.mrf.mxu0 }
 0x25e   : > { %v2520_v22 = vpop.f32.mrf.mxu1  ;;  %2823 = vmatmul.mubr.f32.gmra.mxu0 %v3689_v9  ;;  %v2348_v51 = vadd.f32 %v4775_v32, %v5189_v1  ;;  %v2356_v32 = vadd.f32 %v4805_v12, %v4593_v7  ;;  %v5195_v1 = vld [vmem:[#allocation85_spill] sm:$0xff] }
 0x25f   : > { %3702 = vtanh.f32 %v2519_v6  ;;  %v2521_v20 = vadd.f32 %v2520_v22, %v2328_v61  ;;  %v5190_v61 = vld [vmem:[#allocation80_spill] sm:$0xff]  ;;  %v2383_v7 = vpop.f32.mrf.mxu0 }
 0x260   : > { %v3691_v0 = vpop.eup %3690  ;;  %3704 = vtanh.f32 %v2517_v21  ;;  %v2522_v28 = vpop.f32.mrf.mxu1  ;;  %v2354_v22 = vadd.f32 %v4795_v41, %v5190_v61  ;;  %v2360_v41 = vadd.f32 %v4821_v5, %v4601_v16 }
 0x261   : > { %v3693_v58 = vpop.eup %3692  ;;  %v2523_v55 = vadd.f32 %v2522_v28, %v2330_v35  ;;  %2827 = vmatprep.mubr.f32.mxu0 %v3691_v0  ;;  %v2385_v16 = vpop.f32.mrf.mxu0 }
 0x262   : > { %v2526_v25 = vpop.f32.mrf.mxu1  ;;  %2828 = vmatmul.mubr.f32.gmra.mxu0 %v3693_v58 }
 0x263   : > { %3706 = vtanh.f32 %v2523_v55  ;;  %v2527_v38 = vadd.f32 %v2526_v25, %v2334_v43  ;;  %v5191_v55 = vld [vmem:[#allocation81_spill] sm:$0xff] }
 0x264   : > { %v3695_v56 = vpop.eup %3694  ;;  %3708 = vtanh.f32 %v2521_v20  ;;  %v2528_v23 = vpop.f32.mrf.mxu1  ;;  %v2358_v40 = vadd.f32 %v4815_v26, %v5191_v55  ;;  %v2366_v26 = vadd.f32 %v4831_v63, %v4609_v29  ;;  %v5199_v55 = vld [vmem:[#allocation89_spill] sm:$0xff] }
 0x265   : > { %v3697_v14 = vpop.eup %3696  ;;  %v2529_v33 = vadd.f32 %v2528_v23, %v2336_v27  ;;  %2832 = vmatprep.mubr.f32.mxu0 %v3695_v56  ;;  %v5192_v23 = vld [vmem:[#allocation82_spill] sm:$0xff]  ;;  %v2387_v29 = vpop.f32.mrf.mxu0 }
 0x266   : > { %v2530_v37 = vpop.f32.mrf.mxu1  ;;  %2833 = vmatmul.mubr.f32.gmra.mxu0 %v3697_v14  ;;  %v2364_v14 = vadd.f32 %v4825_v31, %v5192_v23  ;;  %v2370_v31 = vadd.f32 %v4843_v11, %v4617_v45 }
 0x267   : > { %3710 = vtanh.f32 %v2529_v33  ;;  %v2531_v47 = vadd.f32 %v2530_v37, %v2338_v39  ;;  %v2389_v45 = vpop.f32.mrf.mxu0 }
 0x268   : > { %v3699_v34 = vpop.eup %3698  ;;  %3712 = vtanh.f32 %v2527_v38  ;;  %v2532_v10 = vpop.f32.mrf.mxu1 }
 0x269   : > { %v3701_v17 = vpop.eup %3700  ;;  %v2533_v57 = vadd.f32 %v2532_v10, %v2340_v3  ;;  %2837 = vmatprep.mubr.f32.mxu0 %v3699_v34  ;;  %v5193_v34 = vld [vmem:[#allocation83_spill] sm:$0xff] }
 0x26a   : > { %v2536_v19 = vpop.f32.mrf.mxu1  ;;  %2838 = vmatmul.mubr.f32.gmra.mxu0 %v3701_v17 }
 0x26b   : > { %3714 = vtanh.f32 %v2533_v57  ;;  %v2537_v15 = vadd.f32 %v2536_v19, %v2344_v36  ;;  %v5194_v19 = vld [vmem:[#allocation84_spill] sm:$0xff] }
 0x26c   : > { %v3703_v44 = vpop.eup %3702  ;;  %3716 = vtanh.f32 %v2531_v47  ;;  %v2538_v2 = vpop.f32.mrf.mxu1  ;;  %v2368_v47 = vadd.f32 %v4837_v8, %v5193_v34  ;;  %v2376_v8 = vadd.f32 %v4855_v48, %v4625_v60 }
 0x26d   : > { %v3705_v54 = vpop.eup %3704  ;;  %v2539_v18 = vadd.f32 %v2538_v2, %v2346_v30  ;;  %2842 = vmatprep.mubr.f32.mxu0 %v3703_v44  ;;  %v2374_v30 = vadd.f32 %v4849_v52, %v5194_v19  ;;  %v2380_v52 = vadd.f32 %v2379_v59, %v4633_v13 }
 0x26e   : > { %v2540_v21 = vpop.f32.mrf.mxu1  ;;  %2843 = vmatmul.mubr.f32.gmra.mxu0 %v3705_v54 }
 0x26f   : > { %3718 = vtanh.f32 %v2539_v18  ;;  %v2541_v49 = vadd.f32 %v2540_v21, %v2348_v51  ;;  %v2378_v51 = vadd.f32 %v4861_v24, %v5195_v1 }
 0x270   : > { %v3707_v53 = vpop.eup %3706  ;;  %3720 = vtanh.f32 %v2537_v15  ;;  %v2542_v9 = vpop.f32.mrf.mxu1 }
 0x271   : > { %v3709_v6 = vpop.eup %3708  ;;  %v2543_v50 = vadd.f32 %v2542_v9, %v2350_v42  ;;  %2847 = vmatprep.mubr.f32.mxu0 %v3707_v53  ;;  %v2393_v53 = vpop.f32.mrf.mxu0 }
 0x272   : > { %v2546_v35 = vpop.f32.mrf.mxu1  ;;  %2848 = vmatmul.mubr.f32.gmra.mxu0 %v3709_v6  ;;  %v5196_v6 = vld [vmem:[#allocation86_spill] sm:$0xff] }
 0x273   : > { %3722 = vtanh.f32 %v2543_v50  ;;  %v2547_v0 = vadd.f32 %v2546_v35, %v2354_v22  ;;  %v2384_v50 = vadd.f32 %v2383_v7, %v5196_v6  ;;  %v5197_v22 = vld [vmem:[#allocation87_spill] sm:$0xff] }
 0x274   : > { %v3711_v62 = vpop.eup %3710  ;;  %3724 = vtanh.f32 %v2541_v49  ;;  %v2548_v20 = vpop.f32.mrf.mxu1  ;;  %v2386_v35 = vadd.f32 %v2385_v16, %v5197_v22 }
 0x275   : > { %v3713_v28 = vpop.eup %3712  ;;  %v2549_v58 = vadd.f32 %v2548_v20, %v2356_v32  ;;  %2852 = vmatprep.mubr.f32.mxu0 %v3711_v62  ;;  %v2395_v32 = vpop.f32.mrf.mxu0  ;;  %v5198_v20 = vld [vmem:[#allocation88_spill] sm:$0xff] }
 0x276   : > { %v2550_v43 = vpop.f32.mrf.mxu1  ;;  %2853 = vmatmul.mubr.f32.gmra.mxu0 %v3713_v28  ;;  %v2388_v28 = vadd.f32 %v2387_v29, %v5198_v20 }
 0x277   : > { %3726 = vtanh.f32 %v2549_v58  ;;  %v2551_v12 = vadd.f32 %v2550_v43, %v2358_v40  ;;  %v2390_v40 = vadd.f32 %v2389_v45, %v5199_v55 }
 0x278   : > { %v3715_v25 = vpop.eup %3714  ;;  %3728 = vtanh.f32 %v2547_v0  ;;  %v2552_v27 = vpop.f32.mrf.mxu1 }
 0x279   : > { %v3717_v56 = vpop.eup %3716  ;;  %v2553_v38 = vadd.f32 %v2552_v27, %v2360_v41  ;;  %2857 = vmatprep.mubr.f32.mxu0 %v3715_v25  ;;  %v2397_v41 = vpop.f32.mrf.mxu0 }
 0x27a   : > { %v2556_v33 = vpop.f32.mrf.mxu1  ;;  %2858 = vmatmul.mubr.f32.gmra.mxu0 %v3717_v56  ;;  %v5200_v56 = vld [vmem:[#allocation90_spill] sm:$0xff] }
 0x27b   : > { %3730 = vtanh.f32 %v2553_v38  ;;  %v2557_v5 = vadd.f32 %v2556_v33, %v2364_v14  ;;  %v2394_v38 = vadd.f32 %v2393_v53, %v5200_v56  ;;  %v5201_v14 = vld [vmem:[#allocation91_spill] sm:$0xff] }
 0x27c   : > { %v3719_v46 = vpop.eup %3718  ;;  %3732 = vtanh.f32 %v2551_v12  ;;  %v2558_v39 = vpop.f32.mrf.mxu1  ;;  %v2396_v33 = vadd.f32 %v2395_v32, %v5201_v14 }
 0x27d   : > { %v3721_v37 = vpop.eup %3720  ;;  %v2559_v3 = vadd.f32 %v2558_v39, %v2366_v26  ;;  %2862 = vmatprep.mubr.f32.mxu0 %v3719_v46  ;;  %v2399_v46 = vpop.f32.mrf.mxu0 }
 0x27e   : > { %v2560_v10 = vpop.f32.mrf.mxu1  ;;  %2863 = vmatmul.mubr.f32.gmra.mxu0 %v3721_v37 }
 0x27f   : > { %3734 = vtanh.f32 %v2559_v3  ;;  %v2561_v63 = vadd.f32 %v2560_v10, %v2368_v47  ;;  %v5202_v3 = vld [vmem:[#allocation92_spill] sm:$0xff]  ;;  %v5203_v10 = vld [vmem:[#allocation93_spill] sm:$0xff] }
 0x280   : > { %v3723_v17 = vpop.eup %3722  ;;  %3736 = vtanh.f32 %v2557_v5  ;;  %v2562_v57 = vpop.f32.mrf.mxu1  ;;  %v2398_v34 = vadd.f32 %v2397_v41, %v5202_v3 }
 0x281   : > { %v3725_v4 = vpop.eup %3724  ;;  %v2563_v36 = vadd.f32 %v2562_v57, %v2370_v31  ;;  %2867 = vmatprep.mubr.f32.mxu0 %v3723_v17  ;;  %v2400_v31 = vadd.f32 %v2399_v46, %v5203_v10 }
 0x282   : > { %v2566_v44 = vpop.f32.mrf.mxu1  ;;  %2868 = vmatmul.mubr.f32.gmra.mxu0 %v3725_v4 }
 0x283   : > { %3738 = vtanh.f32 %v2563_v36  ;;  %v2567_v11 = vadd.f32 %v2566_v44, %v2374_v30 }
 0x284   : > { %v3727_v15 = vpop.eup %3726  ;;  %3740 = vtanh.f32 %v2561_v63  ;;  %v2568_v2 = vpop.f32.mrf.mxu1 }
 0x285   : > { %v3729_v54 = vpop.eup %3728  ;;  %v2569_v18 = vadd.f32 %v2568_v2, %v2376_v8  ;;  %2872 = vmatprep.mubr.f32.mxu0 %v3727_v15  ;;  %v4898_v2 = vld [vmem:[%s5020_s4] ss:$0 sm:$0xff] }
 0x286   : > { %v2570_v21 = vpop.f32.mrf.mxu1  ;;  %2873 = vmatmul.mubr.f32.gmra.mxu0 %v3729_v54 }
 0x287   : > { %3742 = vtanh.f32 %v2569_v18  ;;  %v2571_v60 = vadd.f32 %v2570_v21, %v2378_v51 }
 0x288   : > { %v3731_v42 = vpop.eup %3730  ;;  %3744 = vtanh.f32 %v2567_v11  ;;  %v2572_v48 = vpop.f32.mrf.mxu1 }
 0x289   : > { %v3733_v49 = vpop.eup %3732  ;;  %v2573_v9 = vadd.f32 %v2572_v48, %v2380_v52  ;;  %2877 = vmatprep.mubr.f32.mxu0 %v3731_v42 }
 0x28a   : > { %v2576_v61 = vpop.f32.mrf.mxu1  ;;  %2878 = vmatmul.mubr.f32.gmra.mxu0 %v3733_v49 }
 0x28b   : > { %3746 = vtanh.f32 %v2573_v9  ;;  %v2577_v13 = vadd.f32 %v2576_v61, %v2384_v50 }
 0x28c   : > { %v3735_v24 = vpop.eup %3734  ;;  %3748 = vtanh.f32 %v2571_v60  ;;  %v2578_v62 = vpop.f32.mrf.mxu1 }
 0x28d   : > { %v3737_v59 = vpop.eup %3736  ;;  %v2579_v0 = vadd.f32 %v2578_v62, %v2386_v35  ;;  %2882 = vmatprep.mubr.f32.mxu0 %v3735_v24 }
 0x28e   : > { %v2580_v58 = vpop.f32.mrf.mxu1  ;;  %2883 = vmatmul.mubr.f32.gmra.mxu0 %v3737_v59 }
 0x28f   : > { %3750 = vtanh.f32 %v2579_v0  ;;  %v2581_v25 = vadd.f32 %v2580_v58, %v2388_v28 }
 0x290   : > { %v3739_v43 = vpop.eup %3738  ;;  %3752 = vtanh.f32 %v2577_v13  ;;  %v2582_v7 = vpop.f32.mrf.mxu1 }
 0x291   : > { %v3741_v12 = vpop.eup %3740  ;;  %v2583_v27 = vadd.f32 %v2582_v7, %v2390_v40  ;;  %2887 = vmatprep.mubr.f32.mxu0 %v3739_v43 }
 0x292   : > { %v2586_v23 = vpop.f32.mrf.mxu1  ;;  %2888 = vmatmul.mubr.f32.gmra.mxu0 %v3741_v12 }
 0x293   : > { %3754 = vtanh.f32 %v2583_v27  ;;  %v2587_v16 = vadd.f32 %v2586_v23, %v2394_v38 }
 0x294   : > { %v3743_v26 = vpop.eup %3742  ;;  %3756 = vtanh.f32 %v2581_v25  ;;  %v2588_v5 = vpop.f32.mrf.mxu1 }
 0x295   : > { %v3745_v39 = vpop.eup %3744  ;;  %v2589_v37 = vadd.f32 %v2588_v5, %v2396_v33  ;;  %2892 = vmatprep.mubr.f32.mxu0 %v3743_v26 }
 0x296   : > { %v2590_v47 = vpop.f32.mrf.mxu1  ;;  %2893 = vmatmul.mubr.f32.gmra.mxu0 %v3745_v39 }
 0x297   : > { %3758 = vtanh.f32 %v2589_v37  ;;  %v2591_v29 = vadd.f32 %v2590_v47, %v2398_v34 }
 0x298   : > { %v3747_v17 = vpop.eup %3746  ;;  %3760 = vtanh.f32 %v2587_v16  ;;  %v2592_v63 = vpop.f32.mrf.mxu1 }
 0x299   : > { %v3749_v57 = vpop.eup %3748  ;;  %v2593_v4 = vadd.f32 %v2592_v63, %v2400_v31  ;;  %2897 = vmatprep.mubr.f32.mxu0 %v3747_v17 }
 0x29a   : > { %2898 = vmatmul.mubr.f32.gmra.mxu0 %v3749_v57 }
 0x29b   : > { %3762 = vtanh.f32 %v2593_v4 }
 0x29c   : > { %v3751_v36 = vpop.eup %3750  ;;  %3764 = vtanh.f32 %v2591_v29 }
 0x29d   : > { %v3753_v19 = vpop.eup %3752  ;;  %2902 = vmatprep.mubr.f32.mxu0 %v3751_v36 }
 0x29e   : > { %2903 = vmatmul.mubr.f32.gmra.mxu0 %v3753_v19 }
 0x2a0   : > { %v3755_v30 = vpop.eup %3754 }
 0x2a1   : > { %v3757_v44 = vpop.eup %3756  ;;  %2907 = vmatprep.mubr.f32.mxu0 %v3755_v30 }
 0x2a2   : > { %2908 = vmatmul.mubr.f32.gmra.mxu0 %v3757_v44 }
 0x2a4   : > { %v3759_v8 = vpop.eup %3758 }
 0x2a5   : > { %v3761_v15 = vpop.eup %3760  ;;  %2912 = vmatprep.mubr.f32.mxu0 %v3759_v8 }
 0x2a6   : > { %2913 = vmatmul.mubr.f32.gmra.mxu0 %v3761_v15 }
 0x2a8   : > { %v3763_v45 = vpop.eup %3762 }
 0x2a9   : > { %v3765_v11 = vpop.eup %3764  ;;  %2917 = vmatprep.mubr.f32.mxu0 %v3763_v45 }
 0x2aa   : > { %2918 = vmatmul.mubr.f32.gmra.mxu0 %v3765_v11 }
 0x2ee   : > { %v2764_v54 = vpop.f32.mrf.mxu0 }
 0x2ef   : > { %v2765_v18 = vadd.f32 %v4898_v2, %v2764_v54 }
 0x2f0   : > { %v2766_v1 = vpop.f32.mrf.mxu0 }
 0x2f1   : > { %2923 = vst [vmem:[%s4901_s12] sm:$0xff] %v2765_v18 }
 0x2f2   : > { %v2769_v51 = vpop.f32.mrf.mxu0 }
 0x2f3   : > { %v2770_v21 = vadd.f32 %v4898_v2, %v2769_v51 }
 0x2f4   : > { %v2771_v52 = vpop.f32.mrf.mxu0 }
 0x2f5   : > { %2924 = vst [vmem:[%s4901_s12 + $0x8] sm:$0xff] %v2770_v21 }
 0x2f6   : > { %v2774_v42 = vpop.f32.mrf.mxu0 }
 0x2f7   : > { %v2775_v53 = vadd.f32 %v4898_v2, %v2774_v42 }
 0x2f8   : > { %v2776_v60 = vpop.f32.mrf.mxu0 }
 0x2f9   : > { %2925 = vst [vmem:[%s4901_s12 + $0x10] sm:$0xff] %v2775_v53 }
 0x2fa   : > { %v2779_v48 = vpop.f32.mrf.mxu0 }
 0x2fb   : > { %v2780_v49 = vadd.f32 %v4898_v2, %v2779_v48 }
 0x2fc   : > { %v2781_v9 = vpop.f32.mrf.mxu0 }
 0x2fd   : > { %2926 = vst [vmem:[%s4901_s12 + $0x18] sm:$0xff] %v2780_v49 }
 0x2fe   : > { %v2784_v6 = vpop.f32.mrf.mxu0 }
 0x2ff   : > { %v2785_v50 = vadd.f32 %v4898_v2, %v2784_v6 }
 0x300   : > { %v2786_v61 = vpop.f32.mrf.mxu0 }
 0x301   : > { %2927 = vst [vmem:[%s4901_s12 + $0x20] sm:$0xff] %v2785_v50 }
 0x302   : > { %v2789_v22 = vpop.f32.mrf.mxu0 }
 0x303   : > { %v2790_v35 = vadd.f32 %v4898_v2, %v2789_v22 }
 0x304   : > { %v2791_v24 = vpop.f32.mrf.mxu0 }
 0x305   : > { %2928 = vst [vmem:[%s4901_s12 + $0x28] sm:$0xff] %v2790_v35 }
 0x306   : > { %v2794_v32 = vpop.f32.mrf.mxu0 }
 0x307   : > { %v2795_v13 = vadd.f32 %v4898_v2, %v2794_v32 }
 0x308   : > { %v2796_v62 = vpop.f32.mrf.mxu0 }
 0x309   : > { %2929 = vst [vmem:[%s4901_s12 + $0x30] sm:$0xff] %v2795_v13 }
 0x30a   : > { %v2799_v59 = vpop.f32.mrf.mxu0 }
 0x30b   : > { %v2800_v0 = vadd.f32 %v4898_v2, %v2799_v59 }
 0x30c   : > { %v2801_v20 = vpop.f32.mrf.mxu0 }
 0x30d   : > { %2930 = vst [vmem:[%s4901_s12 + $0x38] sm:$0xff] %v2800_v0 }
 0x30e   : > { %v2804_v28 = vpop.f32.mrf.mxu0 }
 0x30f   : > { %v2805_v58 = vadd.f32 %v4898_v2, %v2804_v28 }
 0x310   : > { %v2806_v55 = vpop.f32.mrf.mxu0 }
 0x311   : > { %2931 = vst [vmem:[%s4901_s12 + $0x40] sm:$0xff] %v2805_v58 }
 0x312   : > { %v2809_v40 = vpop.f32.mrf.mxu0 }
 0x313   : > { %v2810_v43 = vadd.f32 %v4898_v2, %v2809_v40 }
 0x314   : > { %v2811_v41 = vpop.f32.mrf.mxu0 }
 0x315   : > { %2932 = vst [vmem:[%s4901_s12 + $0x48] sm:$0xff] %v2810_v43 }
 0x316   : > { %v2814_v25 = vpop.f32.mrf.mxu0 }
 0x317   : > { %v2815_v7 = vadd.f32 %v4898_v2, %v2814_v25 }
 0x318   : > { %v2816_v12 = vpop.f32.mrf.mxu0 }
 0x319   : > { %2933 = vst [vmem:[%s4901_s12 + $0x50] sm:$0xff] %v2815_v7 }
 0x31a   : > { %v2819_v27 = vpop.f32.mrf.mxu0 }
 0x31b   : > { %v2820_v56 = vadd.f32 %v4898_v2, %v2819_v27 }
 0x31c   : > { %v2821_v38 = vpop.f32.mrf.mxu0 }
 0x31d   : > { %2934 = vst [vmem:[%s4901_s12 + $0x58] sm:$0xff] %v2820_v56 }
 0x31e   : > { %v2824_v23 = vpop.f32.mrf.mxu0 }
 0x31f   : > { %v2825_v14 = vadd.f32 %v4898_v2, %v2824_v23 }
 0x320   : > { %v2826_v33 = vpop.f32.mrf.mxu0 }
 0x321   : > { %2935 = vst [vmem:[%s4901_s12 + $0x60] sm:$0xff] %v2825_v14 }
 0x322   : > { %v2829_v26 = vpop.f32.mrf.mxu0 }
 0x323   : > { %v2830_v46 = vadd.f32 %v4898_v2, %v2829_v26 }
 0x324   : > { %v2831_v16 = vpop.f32.mrf.mxu0 }
 0x325   : > { %2936 = vst [vmem:[%s4901_s12 + $0x68] sm:$0xff] %v2830_v46 }
 0x326   : > { %v2834_v5 = vpop.f32.mrf.mxu0 }
 0x327   : > { %v2835_v39 = vadd.f32 %v4898_v2, %v2834_v5 }
 0x328   : > { %v2836_v37 = vpop.f32.mrf.mxu0 }
 0x329   : > { %2937 = vst [vmem:[%s4901_s12 + $0x70] sm:$0xff] %v2835_v39 }
 0x32a   : > { %v2839_v3 = vpop.f32.mrf.mxu0 }
 0x32b   : > { %v2840_v34 = vadd.f32 %v4898_v2, %v2839_v3 }
 0x32c   : > { %v2841_v47 = vpop.f32.mrf.mxu0 }
 0x32d   : > { %2938 = vst [vmem:[%s4901_s12 + $0x78] sm:$0xff] %v2840_v34 }
 0x32e   : > { %v2844_v10 = vpop.f32.mrf.mxu0 }
 0x32f   : > { %v2845_v31 = vadd.f32 %v4898_v2, %v2844_v10 }
 0x330   : > { %v2846_v17 = vpop.f32.mrf.mxu0 }
 0x331   : > { %2939 = vst [vmem:[%s4901_s12 + $0x80] sm:$0xff] %v2845_v31 }
 0x332   : > { %v2849_v29 = vpop.f32.mrf.mxu0 }
 0x333   : > { %v2850_v63 = vadd.f32 %v4898_v2, %v2849_v29 }
 0x334   : > { %v2851_v57 = vpop.f32.mrf.mxu0 }
 0x335   : > { %2940 = vst [vmem:[%s4901_s12 + $0x88] sm:$0xff] %v2850_v63 }
 0x336   : > { %v2854_v4 = vpop.f32.mrf.mxu0 }
 0x337   : > { %v2855_v36 = vadd.f32 %v4898_v2, %v2854_v4 }
 0x338   : > { %v2856_v19 = vpop.f32.mrf.mxu0 }
 0x339   : > { %2941 = vst [vmem:[%s4901_s12 + $0x90] sm:$0xff] %v2855_v36 }
 0x33a   : > { %v2859_v30 = vpop.f32.mrf.mxu0 }
 0x33b   : > { %v2860_v44 = vadd.f32 %v4898_v2, %v2859_v30 }
 0x33c   : > { %v2861_v8 = vpop.f32.mrf.mxu0 }
 0x33d   : > { %2942 = vst [vmem:[%s4901_s12 + $0x98] sm:$0xff] %v2860_v44 }
 0x33e   : > { %v2864_v15 = vpop.f32.mrf.mxu0 }
 0x33f   : > { %v2865_v45 = vadd.f32 %v4898_v2, %v2864_v15 }
 0x340   : > { %v2866_v11 = vpop.f32.mrf.mxu0 }
 0x341   : > { %2943 = vst [vmem:[%s4901_s12 + $0xa0] sm:$0xff] %v2865_v45 }
 0x342   : > { %v2869_v54 = vpop.f32.mrf.mxu0 }
 0x343   : > { %v2870_v18 = vadd.f32 %v4898_v2, %v2869_v54 }
 0x344   : > { %v2871_v1 = vpop.f32.mrf.mxu0 }
 0x345   : > { %2944 = vst [vmem:[%s4901_s12 + $0xa8] sm:$0xff] %v2870_v18 }
 0x346   : > { %v2874_v51 = vpop.f32.mrf.mxu0 }
 0x347   : > { %v2875_v21 = vadd.f32 %v4898_v2, %v2874_v51 }
 0x348   : > { %v2876_v52 = vpop.f32.mrf.mxu0 }
 0x349   : > { %2945 = vst [vmem:[%s4901_s12 + $0xb0] sm:$0xff] %v2875_v21 }
 0x34a   : > { %v2879_v42 = vpop.f32.mrf.mxu0 }
 0x34b   : > { %v2880_v53 = vadd.f32 %v4898_v2, %v2879_v42 }
 0x34c   : > { %v2881_v60 = vpop.f32.mrf.mxu0 }
 0x34d   : > { %2946 = vst [vmem:[%s4901_s12 + $0xb8] sm:$0xff] %v2880_v53 }
 0x34e   : > { %v2884_v48 = vpop.f32.mrf.mxu0 }
 0x34f   : > { %v2885_v49 = vadd.f32 %v4898_v2, %v2884_v48 }
 0x350   : > { %v2886_v9 = vpop.f32.mrf.mxu0 }
 0x351   : > { %2947 = vst [vmem:[%s4901_s12 + $0xc0] sm:$0xff] %v2885_v49 }
 0x352   : > { %v2889_v6 = vpop.f32.mrf.mxu0 }
 0x353   : > { %v2890_v50 = vadd.f32 %v4898_v2, %v2889_v6 }
 0x354   : > { %v2891_v61 = vpop.f32.mrf.mxu0 }
 0x355   : > { %2948 = vst [vmem:[%s4901_s12 + $0xc8] sm:$0xff] %v2890_v50 }
 0x356   : > { %v2894_v22 = vpop.f32.mrf.mxu0 }
 0x357   : > { %v2895_v35 = vadd.f32 %v4898_v2, %v2894_v22 }
 0x358   : > { %v2896_v24 = vpop.f32.mrf.mxu0 }
 0x359   : > { %2949 = vst [vmem:[%s4901_s12 + $0xd0] sm:$0xff] %v2895_v35 }
 0x35a   : > { %v2899_v32 = vpop.f32.mrf.mxu0 }
 0x35b   : > { %v2900_v13 = vadd.f32 %v4898_v2, %v2899_v32 }
 0x35c   : > { %v2901_v62 = vpop.f32.mrf.mxu0 }
 0x35d   : > { %2950 = vst [vmem:[%s4901_s12 + $0xd8] sm:$0xff] %v2900_v13 }
 0x35e   : > { %v2904_v59 = vpop.f32.mrf.mxu0 }
 0x35f   : > { %v2905_v0 = vadd.f32 %v4898_v2, %v2904_v59 }
 0x360   : > { %v2906_v20 = vpop.f32.mrf.mxu0 }
 0x361   : > { %2951 = vst [vmem:[%s4901_s12 + $0xe0] sm:$0xff] %v2905_v0 }
 0x362   : > { %v2909_v28 = vpop.f32.mrf.mxu0 }
 0x363   : > { %v2910_v58 = vadd.f32 %v4898_v2, %v2909_v28 }
 0x364   : > { %v2911_v55 = vpop.f32.mrf.mxu0 }
 0x365   : > { %2952 = vst [vmem:[%s4901_s12 + $0xe8] sm:$0xff] %v2910_v58 }
 0x366   : > { %v2914_v40 = vpop.f32.mrf.mxu0 }
 0x367   : > { %v2915_v43 = vadd.f32 %v4898_v2, %v2914_v40 }
 0x368   : > { %v2916_v41 = vpop.f32.mrf.mxu0 }
 0x369   : > { %2953 = vst [vmem:[%s4901_s12 + $0xf0] sm:$0xff] %v2915_v43 }
 0x36a   : > { %v2919_v25 = vpop.f32.mrf.mxu0 }
 0x36b   : > { %v2920_v7 = vadd.f32 %v4898_v2, %v2919_v25 }
 0x36c   : > { %v2921_v12 = vpop.f32.mrf.mxu0 }
 0x36d   : > { %2954 = vst [vmem:[%s4901_s12 + $0xf8] sm:$0xff] %v2920_v7 }
 0x36e   : > { %3859 = shalt.err (!%p3856_p9)
}
 0x36f   : > { %s3860_s24 = scalar_lea.hbm %s4969_s13, 4096  ;;  %s3864_s10 = scalar_lea.hbm %s5021_s5, 8192 }
 0x370   : > { %p3861_p13 = scmp.ne.s32.totalorder %s4969_s13, %s3860_s24  ;;  %p3865_p4 = scmp.lt.s32.totalorder %s4969_s13, %s5021_s5 }
 0x371   : > { %p3866_p8 = scmp.lt.s32.totalorder %s3864_s10, %s3860_s24 }
 0x372   : > { %p3862_p5 = pnand %p3861_p13, %p5204_p10 }
 0x373   : > { %p3867_p3 = por %p3866_p8, %p3865_p4 }
 0x374   : > { %p3863_p0 = pneg %p3862_p5 }
 0x376   : > { %p3868_p11 = pnand %p3867_p3, %p3863_p0 }
 0x378   : > { %3871 = shalt.err (!%p3868_p11)
}
 0x379   : > { %s3925_s28 = smov 128   ;;  %s3926_s7 = smov 8  }
 0x37a   : > { %3382 = dma.vmem_to_hbm [thread:$0]  (%p5204_p10), %s4971_s6, 4096, %s4969_s13, %s2956_s14, %s3925_s28, %s3925_s28, %s3926_s7  }
 0x37b PF: > { %s2984_s9 = sand.u32 1, %s3902_s18   ;;  %p5205_p1 = scmp.ne.s32.totalorder %s5029_s25, 0 }
 0x37c   : > { %p5206_p2 = scmp.ge.s32.totalorder %s3914_s21, 2  ;;  %s2985_s22 = scalar_lea.sflag [#allocation4], %s2984_s9 }
 0x37e   : > { %p3396_p6 = pnand %p5206_p2, %p5205_p1 }
 0x380   : > { %p3397_p12 = pneg %p3396_p6 }
 0x382   : > { %3897 = dma.done.wait (%p3397_p12), %s2985_s22, 4096  }
 0x383   : > { %3899 = vsyncadd (%p3397_p12), %s2985_s22, 4294963200  ;;  %p19_p7 = scmp.ge.s32.totalorder %s4029_s15, 4   ;;  %s5207_s18 = smov %s3906_s19 }
 0x384   : > { %s5208_s19 = smov %s3910_s20  ;;  %s5209_s20 = smov %s4045_s27 }
 0x385   : > { %s5210_s21 = smov %s4029_s15  ;;  %21 = sbr.rel (!%p19_p7) target bundleno = 6 (0x6), region = 93 }
 0x38a   :  { %2990 = vsyncpa [#allocation3], 1 }
 0x38b   :  { %2992 = vsyncpa [#allocation3 + $0x1], 1 }
 0x38c   :  { %2993 = vsyncpa [#allocation6], 1 }
 0x38d   :  { %2994 = vsyncpa [#allocation4], 1 }
 0x38e   :  { %2996 = vsyncpa [#allocation4 + $0x1], 1 }

</bundles_post_ra>
